<compile_context>
chip_gen: v6e
topology: v6e:2x2x1
jax: 0.10.0
libtpu: 0.0.40
codegen_flags: <defaults>
</compile_context>

<pallas_src>
import functools
import math

import jax
import jax.numpy as jnp
from jax.experimental import pallas as pl
from jax.experimental.pallas import tpu as pltpu

OUT_PER_SCALE = 100            # ChebConv(in_channels, 100, K) per the module
OUT_TOTAL = 3 * OUT_PER_SCALE  # 300
LANE = 128


def _round_up(v, m):
    return ((v + m - 1) // m) * m


def _vmem_limit_bytes():
    """Scoped-VMEM budget: conservative on v7x (64 MiB physical per TC),
    generous on v5e/v6e (128 MiB).  Safe 32 MiB fallback if the query is
    unavailable."""
    try:
        cap = int(pltpu.get_tpu_info().vmem_capacity_bytes)
        return max(32 * 1024 * 1024, min(96 * 1024 * 1024, (cap * 11) // 20))
    except Exception:
        return 32 * 1024 * 1024


# ----------------------------------------------------------------- kernels ---
def _fused_kernel(l_ref, x_ref, wa_ref, wb_ref, wc_ref, b_ref, out_ref,
                  t1_ref, *, tm):
    """Fused single-pass kernel for graphs whose L_hat fits in VMEM.

    Grid: (row tiles,), run sequentially ("arbitrary") so the T1 scratch
    built at i == 0 is visible to every later row tile.  L_hat is read from
    HBM exactly once; T1 lives only in VMEM (no HBM round-trip)."""
    i = pl.program_id(0)

    @pl.when(i == 0)
    def _():                                   # T1 = L_hat @ X  (all rows)
        t1_ref[...] = jnp.dot(
            l_ref[...], x_ref[...], preferred_element_type=jnp.float32
        ).astype(t1_ref.dtype)

    r0 = pl.multiple_of(i * tm, LANE)          # row-tile offset (aligned)
    t0 = x_ref[pl.ds(r0, tm), :]
    t1 = t1_ref[pl.ds(r0, tm), :]
    # (L_hat @ T1) row tile; the explicit T2 = 2*L@T1 - T0 is folded into WA/WC.
    lt1 = jnp.dot(l_ref[pl.ds(r0, tm), :], t1_ref[...],
                  preferred_element_type=jnp.float32).astype(t0.dtype)
    acc = jnp.dot(t0, wa_ref[...], preferred_element_type=jnp.float32)
    acc += jnp.dot(t1, wb_ref[...], preferred_element_type=jnp.float32)
    acc += jnp.dot(lt1, wc_ref[...], preferred_element_type=jnp.float32)
    out_ref[...] = (acc + b_ref[...]).astype(out_ref.dtype)


def _t1_tiled_kernel(l_ref, x_ref, t1_ref, acc_ref):
    """Pass 1 (large graphs): T1 = L_hat @ X with the contraction axis tiled."""
    k = pl.program_id(1)

    @pl.when(k == 0)
    def _():
        acc_ref[...] = jnp.zeros_like(acc_ref)

    acc_ref[...] += jnp.dot(l_ref[...], x_ref[...],
                            preferred_element_type=jnp.float32)

    @pl.when(k == pl.num_programs(1) - 1)
    def _():
        t1_ref[...] = acc_ref[...].astype(t1_ref.dtype)


def _out_tiled_kernel(l_ref, t1k_ref, t0_ref, t1r_ref, wa_ref, wb_ref, wc_ref,
                      b_ref, out_ref, acc_ref):
    """Pass 2 (large graphs): accumulate (L_hat @ T1) over the contraction
    axis, then apply the folded feature weights + one lane-dense 384-wide
    store (no T2 materialization, no concat)."""
    k = pl.program_id(1)

    @pl.when(k == 0)
    def _():
        acc_ref[...] = jnp.zeros_like(acc_ref)

    acc_ref[...] += jnp.dot(l_ref[...], t1k_ref[...],
                            preferred_element_type=jnp.float32)

    @pl.when(k == pl.num_programs(1) - 1)
    def _():
        lt1 = acc_ref[...].astype(t0_ref.dtype)
        acc = jnp.dot(t0_ref[...], wa_ref[...], preferred_element_type=jnp.float32)
        acc += jnp.dot(t1r_ref[...], wb_ref[...], preferred_element_type=jnp.float32)
        acc += jnp.dot(lt1, wc_ref[...], preferred_element_type=jnp.float32)
        out_ref[...] = (acc + b_ref[...]).astype(out_ref.dtype)


# ----------------------------------------------------------- plain-JAX glue --
def _scaled_laplacian(x, edge_index, edge_weight):
    """Dense L_hat = 2*L/lambda_max - I, symmetric normalization,
    lambda_max = 2.0 (the torch_geometric ChebConv default), i.e.
    L_hat = -D^-1/2 A D^-1/2.  Computed in f32.
    # TODO(synk): an explicitly supplied lambda_max (largest-eigenvalue power
    # iteration) is not implemented; this matches the module's default path.
    # TODO(synk): for large sparse graphs, replace this dense O(N^2)
    # materialization with a scalar-prefetch CSR SpMM kernel."""
    n = x.shape[0]
    row, col = edge_index[0], edge_index[1]
    w = edge_weight.astype(jnp.float32)
    adj = jnp.zeros((n, n), jnp.float32).at[row, col].add(w)
    deg = jnp.sum(adj, axis=1)
    dinv = jnp.where(deg > 0, jax.lax.rsqrt(deg), 0.0)
    a_norm = dinv[:, None] * adj * dinv[None, :]
    eye = jnp.eye(n, dtype=jnp.float32)
    lap = eye - a_norm                     # L = I - D^-1/2 A D^-1/2
    lambda_max = 2.0
    return (2.0 / lambda_max) * lap - eye  # L_hat = L - I = -A_norm


def init_params(key, in_channels, dtype=jnp.float32):
    """Synthetic ChebConv params: w{k} of shape (K, F_in, 100), b{k} of (1, 100)."""
    params = {}
    for idx, k_order in enumerate((1, 2, 3), start=1):
        key, kw, kb = jax.random.split(key, 3)
        scale = (6.0 / (in_channels + OUT_PER_SCALE)) ** 0.5   # glorot-uniform
        params[f"w{idx}"] = jax.random.uniform(
            kw, (k_order, in_channels, OUT_PER_SCALE), dtype, -scale, scale)
        params[f"b{idx}"] = (0.01 * jax.random.normal(
            kb, (1, OUT_PER_SCALE))).astype(dtype)
    return params


def _fold_params(params, f_in, f_pad, out_pad, compute_dtype):
    """Fold the three ChebConv weight sets AND the T2 recursion into three
    lane-aligned blocks so kernels compute
        out = T0 @ WA + T1 @ WB + (L_hat @ T1) @ WC + b
    (using T2 = 2*L_hat@T1 - T0).  Rows >= f_in are zero padding."""
    c = OUT_PER_SCALE
    wa = jnp.zeros((f_pad, out_pad), jnp.float32)
    wb = jnp.zeros((f_pad, out_pad), jnp.float32)
    wc = jnp.zeros((f_pad, out_pad), jnp.float32)
    wa = wa.at[:f_in, 0:c].set(params["w1"][0])
    wa = wa.at[:f_in, c:2 * c].set(params["w2"][0])
    wa = wa.at[:f_in, 2 * c:3 * c].set(params["w3"][0] - params["w3"][2])
    wb = wb.at[:f_in, c:2 * c].set(params["w2"][1])
    wb = wb.at[:f_in, 2 * c:3 * c].set(params["w3"][1])
    wc = wc.at[:f_in, 2 * c:3 * c].set(2.0 * params["w3"][2])
    b = jnp.zeros((1, out_pad), jnp.float32)
    b = b.at[:, 0:c].set(params["b1"])
    b = b.at[:, c:2 * c].set(params["b2"])
    b = b.at[:, 2 * c:3 * c].set(params["b3"])
    return (wa.astype(compute_dtype), wb.astype(compute_dtype),
            wc.astype(compute_dtype), b)        # bias stays f32 (added post-MXU)


# --------------------------------------------------------------- entry point -
def multichev_forward(x, edge_index, edge_weight, params, *,
                      compute_dtype=jnp.bfloat16, row_tile=512, k_tile=512,
                      fused=None):
    """MultiChev_B forward: returns [N, 300] in x.dtype (concat of 3 scales)."""
    n, f_in = x.shape
    out_dtype = x.dtype
    cs = jnp.dtype(compute_dtype).itemsize

    row_tile = max(LANE, (int(row_tile) // LANE) * LANE)
    k_tile = max(LANE, (int(k_tile) // LANE) * LANE)

    f_pad = _round_up(f_in, LANE)
    out_pad = _round_up(OUT_TOTAL, LANE)          # 384 -> lane-dense stores

    l_hat = _scaled_laplacian(x, edge_index, edge_weight)
    wa, wb, wc, bias = _fold_params(params, f_in, f_pad, out_pad, compute_dtype)
    vmem_limit = _vmem_limit_bytes()

    # ---- fused (fully VMEM-resident L_hat) path sizing -----------------------
    n_pad_f = _round_up(n, LANE)
    if n_pad_f > row_tile:
        n_pad_f = _round_up(n_pad_f, row_tile)
        tm_f = row_tile
    else:
        tm_f = n_pad_f
    # Footprint assuming worst-case double buffering of the resident blocks
    # (constant-index blocks could be single-buffered with
    # pipeline_mode=pl.Buffered(1) where supported; budgeting for 2x keeps the
    # choice safe either way).
    fused_bytes = (2 * n_pad_f * n_pad_f * cs        # L_hat resident
                   + 2 * n_pad_f * f_pad * cs        # X resident
                   + n_pad_f * f_pad * cs            # T1 scratch
                   + 2 * 3 * f_pad * out_pad * cs    # WA / WB / WC
                   + 2 * tm_f * out_pad * 4          # output tiles
                   + 2 * out_pad * 4)                # bias
    if fused is None:
        fused = fused_bytes <= max(16 * 1024 * 1024, vmem_limit - 16 * 1024 * 1024)

    if fused:
        return _forward_fused(x, l_hat, wa, wb, wc, bias, n, f_in, f_pad,
                              out_pad, n_pad_f, tm_f, compute_dtype, out_dtype,
                              vmem_limit)
    tm = min(row_tile, _round_up(n, LANE))
    tk = min(k_tile, _round_up(n, LANE))
    return _forward_tiled(x, l_hat, wa, wb, wc, bias, n, f_in, f_pad, out_pad,
                          tm, tk, compute_dtype, out_dtype, vmem_limit)


def _forward_fused(x, l_hat, wa, wb, wc, bias, n, f_in, f_pad, out_pad,
                   n_pad, tm, compute_dtype, out_dtype, vmem_limit):
    n_tiles = n_pad // tm
    x_p = jnp.zeros((n_pad, f_pad), compute_dtype).at[:n, :f_in].set(
        x.astype(compute_dtype))
    l_p = jnp.zeros((n_pad, n_pad), compute_dtype).at[:n, :n].set(
        l_hat.astype(compute_dtype))

    cs = jnp.dtype(compute_dtype).itemsize
    cost = pl.CostEstimate(
        flops=int(4 * n_pad * n_pad * f_pad + 6 * n_pad * f_pad * out_pad),
        transcendentals=0,
        bytes_accessed=int(n_pad * n_pad * cs + n_pad * f_pad * cs
                           + 3 * f_pad * out_pad * cs
                           + n_pad * out_pad * jnp.dtype(out_dtype).itemsize))

    out_p = pl.pallas_call(
        functools.partial(_fused_kernel, tm=tm),
        out_shape=jax.ShapeDtypeStruct((n_pad, out_pad), out_dtype),
        grid=(n_tiles,),
        in_specs=[
            pl.BlockSpec((n_pad, n_pad), lambda i: (0, 0)),      # L_hat (resident)
            pl.BlockSpec((n_pad, f_pad), lambda i: (0, 0)),      # X     (resident)
            pl.BlockSpec((f_pad, out_pad), lambda i: (0, 0)),    # WA
            pl.BlockSpec((f_pad, out_pad), lambda i: (0, 0)),    # WB
            pl.BlockSpec((f_pad, out_pad), lambda i: (0, 0)),    # WC
            pl.BlockSpec((1, out_pad), lambda i: (0, 0)),        # bias
        ],
        out_specs=pl.BlockSpec((tm, out_pad), lambda i: (i, 0)),
        scratch_shapes=[pltpu.VMEM((n_pad, f_pad), compute_dtype)],   # T1
        compiler_params=pltpu.CompilerParams(
            # Sequential grid: the T1 scratch written at i==0 must be visible
            # to every later row tile (small-N path, single core is fine).
            dimension_semantics=("arbitrary",),
            vmem_limit_bytes=vmem_limit),
        cost_estimate=cost,
    )(l_p, x_p, wa, wb, wc, bias)
    return out_p[:n, :OUT_TOTAL]


def _forward_tiled(x, l_hat, wa, wb, wc, bias, n, f_in, f_pad, out_pad,
                   tm, tk, compute_dtype, out_dtype, vmem_limit):
    n_pad = _round_up(n, math.lcm(tm, tk))
    gi, gk = n_pad // tm, n_pad // tk
    x_p = jnp.zeros((n_pad, f_pad), compute_dtype).at[:n, :f_in].set(
        x.astype(compute_dtype))
    l_p = jnp.zeros((n_pad, n_pad), compute_dtype).at[:n, :n].set(
        l_hat.astype(compute_dtype))

    cparams = pltpu.CompilerParams(
        dimension_semantics=("parallel", "arbitrary"),   # rows across cores,
        vmem_limit_bytes=vmem_limit)                     # contraction sequential
    cs = jnp.dtype(compute_dtype).itemsize

    # ---- pass 1: T1 = L_hat @ X (stored in compute dtype to halve traffic) --
    cost1 = pl.CostEstimate(
        flops=int(2 * n_pad * n_pad * f_pad), transcendentals=0,
        bytes_accessed=int(n_pad * n_pad * cs + gi * n_pad * f_pad * cs
                           + n_pad * f_pad * cs))
    t1 = pl.pallas_call(
        _t1_tiled_kernel,
        out_shape=jax.ShapeDtypeStruct((n_pad, f_pad), compute_dtype),
        grid=(gi, gk),
        in_specs=[
            pl.BlockSpec((tm, tk), lambda i, k: (i, k)),        # L_hat tile
            pl.BlockSpec((tk, f_pad), lambda i, k: (k, 0)),     # X k-rows
        ],
        out_specs=pl.BlockSpec((tm, f_pad), lambda i, k: (i, 0)),
        scratch_shapes=[pltpu.VMEM((tm, f_pad), jnp.float32)],
        compiler_params=cparams,
        cost_estimate=cost1,
    )(l_p, x_p)

    # ---- pass 2: out = T0@WA + T1@WB + (L_hat@T1)@WC + b ---------------------
    cost2 = pl.CostEstimate(
        flops=int(2 * n_pad * n_pad * f_pad + 6 * n_pad * f_pad * out_pad),
        transcendentals=0,
        bytes_accessed=int(n_pad * n_pad * cs + gi * n_pad * f_pad * cs
                           + 2 * n_pad * f_pad * cs + 3 * f_pad * out_pad * cs
                           + n_pad * out_pad * jnp.dtype(out_dtype).itemsize))
    out_p = pl.pallas_call(
        _out_tiled_kernel,
        out_shape=jax.ShapeDtypeStruct((n_pad, out_pad), out_dtype),
        grid=(gi, gk),
        in_specs=[
            pl.BlockSpec((tm, tk), lambda i, k: (i, k)),        # L_hat tile
            pl.BlockSpec((tk, f_pad), lambda i, k: (k, 0)),     # T1 k-rows
            # Row tiles below are only read at k == last; their block index is
            # constant across k so they are fetched once per row tile (no
            # duplicate full-resident T1 copy like the previous version).
            pl.BlockSpec((tm, f_pad), lambda i, k: (i, 0)),     # T0 row tile
            pl.BlockSpec((tm, f_pad), lambda i, k: (i, 0)),     # T1 row tile
            pl.BlockSpec((f_pad, out_pad), lambda i, k: (0, 0)),  # WA
            pl.BlockSpec((f_pad, out_pad), lambda i, k: (0, 0)),  # WB
            pl.BlockSpec((f_pad, out_pad), lambda i, k: (0, 0)),  # WC
            pl.BlockSpec((1, out_pad), lambda i, k: (0, 0)),      # bias
        ],
        out_specs=pl.BlockSpec((tm, out_pad), lambda i, k: (i, 0)),
        scratch_shapes=[pltpu.VMEM((tm, f_pad), jnp.float32)],
        compiler_params=cparams,
        cost_estimate=cost2,
    )(l_p, t1, x_p, t1, wa, wb, wc, bias)
    return out_p[:n, :OUT_TOTAL]


def multichev_reference(x, edge_index, edge_weight, params):
    """Pure-JAX f32 reference (same ChebConv math) for the correctness check."""
    l_hat = _scaled_laplacian(x, edge_index, edge_weight)
    t0 = x.astype(jnp.float32)
    t1 = l_hat @ t0
    t2 = 2.0 * (l_hat @ t1) - t0
    s1 = t0 @ params["w1"][0] + params["b1"]
    s2 = t0 @ params["w2"][0] + t1 @ params["w2"][1] + params["b2"]
    s3 = (t0 @ params["w3"][0] + t1 @ params["w3"][1] + t2 @ params["w3"][2]
          + params["b3"])
    return jnp.concatenate([s1, s2, s3], axis=1)


# ------------------------------------------------------------------ self-test
def _ring_graph(key, n):
    """Symmetric weighted ring graph, deterministic given the key."""
    src = jnp.arange(n, dtype=jnp.int32)
    dst = (src + 1) % n
    row = jnp.concatenate([src, dst])
    col = jnp.concatenate([dst, src])
    edge_index = jnp.stack([row, col], axis=0)          # [2, 2N]
    w = jax.random.uniform(key, (n,), jnp.float32, 0.5, 1.5)
    edge_weight = jnp.concatenate([w, w])                # [2N]
    return edge_index, edge_weight


if __name__ == "__main__":
    key = jax.random.PRNGKey(0)
    k1, k2, k3, k4, k5, k6 = jax.random.split(key, 6)

    # ---- Case 1: tiny spec-like shapes, f32 compute, fused path --------------
    n1, f1 = 16, 8
    x1 = jax.random.normal(k1, (n1, f1), jnp.float32)
    ei1, ew1 = _ring_graph(k2, n1)
    p1 = init_params(k3, f1)
    out1 = jax.block_until_ready(
        multichev_forward(x1, ei1, ew1, p1, compute_dtype=jnp.float32))
    ref1 = multichev_reference(x1, ei1, ew1, p1)
    assert out1.shape == (n1, OUT_TOTAL), out1.shape
    assert jnp.allclose(out1, ref1, atol=1e-4, rtol=1e-4), float(
        jnp.max(jnp.abs(out1 - ref1)))

    # ---- Case 2: ragged shapes (N=300, F=200 > 128), f32, both paths ---------
    n2, f2 = 300, 200
    x2 = jax.random.normal(k4, (n2, f2), jnp.float32)
    ei2, ew2 = _ring_graph(k5, n2)
    p2 = init_params(k6, f2)
    ref2 = multichev_reference(x2, ei2, ew2, p2)

    out2a = jax.block_until_ready(multichev_forward(        # fused, 3 row tiles
        x2, ei2, ew2, p2, compute_dtype=jnp.float32, row_tile=128, fused=True))
    assert jnp.allclose(out2a, ref2, atol=1e-3, rtol=1e-3), float(
        jnp.max(jnp.abs(out2a - ref2)))

    out2b = jax.block_until_ready(multichev_forward(        # tiled 3x3 grid
        x2, ei2, ew2, p2, compute_dtype=jnp.float32,
        row_tile=128, k_tile=128, fused=False))
    assert jnp.allclose(out2b, ref2, atol=1e-3, rtol=1e-3), float(
        jnp.max(jnp.abs(out2b - ref2)))

    # ---- Case 3: default perf config (bf16 MXU inputs, f32 accumulation) -----
    out2c = jax.block_until_ready(multichev_forward(x2, ei2, ew2, p2))
    rel = float(jnp.linalg.norm(out2c - ref2) / jnp.linalg.norm(ref2))
    assert out2c.dtype == ref2.dtype and rel < 2e-2, rel

    print("KERNEL_OK")
</pallas_src>

<mosaic_0001>
module attributes {stable_mosaic.version = 11 : i64} {
  func.func @_fused_kernel(%arg0: i32, %arg1: memref<128x128xf32, #tpu.memory_space<vmem>>, %arg2: memref<128x128xf32, #tpu.memory_space<vmem>>, %arg3: memref<128x384xf32, #tpu.memory_space<vmem>>, %arg4: memref<128x384xf32, #tpu.memory_space<vmem>>, %arg5: memref<128x384xf32, #tpu.memory_space<vmem>>, %arg6: memref<1x384xf32, #tpu.memory_space<vmem>>, %arg7: memref<128x384xf32, #tpu.memory_space<vmem>>, %arg8: memref<128x128xf32, #tpu.memory_space<vmem>>) attributes {dimension_semantics = [#tpu.dimension_semantics<arbitrary>], iteration_bounds = array<i64: 1>, scalar_prefetch = 0 : i64, scratch_operands = 1 : i64, tpu.core_type = #tpu.core_type<tc>, window_params = [{pipeline_mode = #tpu.pipeline_mode<synchronous>, transform_indices = @transform_0, window_bounds = array<i64: 128, 128>}, {pipeline_mode = #tpu.pipeline_mode<synchronous>, transform_indices = @transform_1, window_bounds = array<i64: 128, 128>}, {pipeline_mode = #tpu.pipeline_mode<synchronous>, transform_indices = @transform_2, window_bounds = array<i64: 128, 384>}, {pipeline_mode = #tpu.pipeline_mode<synchronous>, transform_indices = @transform_3, window_bounds = array<i64: 128, 384>}, {pipeline_mode = #tpu.pipeline_mode<synchronous>, transform_indices = @transform_4, window_bounds = array<i64: 128, 384>}, {pipeline_mode = #tpu.pipeline_mode<synchronous>, transform_indices = @transform_5, window_bounds = array<i64: 1, 384>}, {transform_indices = @transform_6, window_bounds = array<i64: 128, 384>}]} {
    %c0_i32 = arith.constant 0 : i32
    %0 = arith.cmpi eq, %arg0, %c0_i32 : i32
    %1 = arith.extui %0 : i1 to i32
    %c0_i32_0 = arith.constant 0 : i32
    %2 = arith.cmpi ne, %1, %c0_i32_0 : i32
    scf.if %2 {
      %c0_18 = arith.constant 0 : index
      %c0_19 = arith.constant 0 : index
      %25 = vector.load %arg1[%c0_18, %c0_19] : memref<128x128xf32, #tpu.memory_space<vmem>>, vector<128x128xf32>
      %c0_20 = arith.constant 0 : index
      %c0_21 = arith.constant 0 : index
      %26 = vector.load %arg2[%c0_20, %c0_21] : memref<128x128xf32, #tpu.memory_space<vmem>>, vector<128x128xf32>
      %cst_22 = arith.constant dense<0.000000e+00> : vector<128x128xf32>
      %27 = tpu.matmul %25, %26, %cst_22 {dimension_numbers = #tpu.dot_dimension_numbers<[1], [0], [0], [1], [0, 0, 1, 1], [], []>} : vector<128x128xf32>, vector<128x128xf32>, vector<128x128xf32> -> vector<128x128xf32>
      %c0_23 = arith.constant 0 : index
      %c0_24 = arith.constant 0 : index
      %28 = vector.load %arg8[%c0_23, %c0_24] : memref<128x128xf32, #tpu.memory_space<vmem>>, vector<128x128xf32>
      tpu.vector_store %arg8[%c0_23, %c0_24], %27 {strides = array<i32>} : memref<128x128xf32, #tpu.memory_space<vmem>>, vector<128x128xf32>,
    } else {
    }
    %c128_i32 = arith.constant 128 : i32
    %3 = arith.muli %arg0, %c128_i32 : i32
    %4 = tpu.assume_multiple %3, 128 : i32
    %5 = arith.index_cast %4 : i32 to index
    %c0 = arith.constant 0 : index
    %6 = vector.load %arg2[%5, %c0] : memref<128x128xf32, #tpu.memory_space<vmem>>, vector<128x128xf32>
    %7 = arith.index_cast %4 : i32 to index
    %c0_1 = arith.constant 0 : index
    %8 = vector.load %arg8[%7, %c0_1] : memref<128x128xf32, #tpu.memory_space<vmem>>, vector<128x128xf32>
    %9 = arith.index_cast %4 : i32 to index
    %c0_2 = arith.constant 0 : index
    %10 = vector.load %arg1[%9, %c0_2] : memref<128x128xf32, #tpu.memory_space<vmem>>, vector<128x128xf32>
    %c0_3 = arith.constant 0 : index
    %c0_4 = arith.constant 0 : index
    %11 = vector.load %arg8[%c0_3, %c0_4] : memref<128x128xf32, #tpu.memory_space<vmem>>, vector<128x128xf32>
    %cst = arith.constant dense<0.000000e+00> : vector<128x128xf32>
    %12 = tpu.matmul %10, %11, %cst {dimension_numbers = #tpu.dot_dimension_numbers<[1], [0], [0], [1], [0, 0, 1, 1], [], []>} : vector<128x128xf32>, vector<128x128xf32>, vector<128x128xf32> -> vector<128x128xf32>
    %c0_5 = arith.constant 0 : index
    %c0_6 = arith.constant 0 : index
    %13 = vector.load %arg3[%c0_5, %c0_6] : memref<128x384xf32, #tpu.memory_space<vmem>>, vector<128x384xf32>
    %cst_7 = arith.constant dense<0.000000e+00> : vector<128x384xf32>
    %14 = tpu.matmul %6, %13, %cst_7 {dimension_numbers = #tpu.dot_dimension_numbers<[1], [0], [0], [1], [0, 0, 1, 1], [], []>} : vector<128x128xf32>, vector<128x384xf32>, vector<128x384xf32> -> vector<128x384xf32>
    %c0_8 = arith.constant 0 : index
    %c0_9 = arith.constant 0 : index
    %15 = vector.load %arg4[%c0_8, %c0_9] : memref<128x384xf32, #tpu.memory_space<vmem>>, vector<128x384xf32>
    %cst_10 = arith.constant dense<0.000000e+00> : vector<128x384xf32>
    %16 = tpu.matmul %8, %15, %cst_10 {dimension_numbers = #tpu.dot_dimension_numbers<[1], [0], [0], [1], [0, 0, 1, 1], [], []>} : vector<128x128xf32>, vector<128x384xf32>, vector<128x384xf32> -> vector<128x384xf32>
    %17 = arith.addf %14, %16 : vector<128x384xf32>
    %c0_11 = arith.constant 0 : index
    %c0_12 = arith.constant 0 : index
    %18 = vector.load %arg5[%c0_11, %c0_12] : memref<128x384xf32, #tpu.memory_space<vmem>>, vector<128x384xf32>
    %cst_13 = arith.constant dense<0.000000e+00> : vector<128x384xf32>
    %19 = tpu.matmul %12, %18, %cst_13 {dimension_numbers = #tpu.dot_dimension_numbers<[1], [0], [0], [1], [0, 0, 1, 1], [], []>} : vector<128x128xf32>, vector<128x384xf32>, vector<128x384xf32> -> vector<128x384xf32>
    %20 = arith.addf %17, %19 : vector<128x384xf32>
    %c0_14 = arith.constant 0 : index
    %c0_15 = arith.constant 0 : index
    %21 = vector.load %arg6[%c0_14, %c0_15] : memref<1x384xf32, #tpu.memory_space<vmem>>, vector<1x384xf32>
    %22 = vector.broadcast %21 : vector<1x384xf32> to vector<128x384xf32>
    %23 = arith.addf %20, %22 : vector<128x384xf32>
    %c0_16 = arith.constant 0 : index
    %c0_17 = arith.constant 0 : index
    %24 = vector.load %arg7[%c0_16, %c0_17] : memref<128x384xf32, #tpu.memory_space<vmem>>, vector<128x384xf32>
    tpu.vector_store %arg7[%c0_16, %c0_17], %23 {strides = array<i32>} : memref<128x384xf32, #tpu.memory_space<vmem>>, vector<128x384xf32>,
    return
  }
  func.func @transform_0(%arg0: i32) -> (i32, i32) {
    %c0_i32 = arith.constant 0 : i32
    %c0_i32_0 = arith.constant 0 : i32
    %c0_i32_1 = arith.constant 0 : i32
    return %c0_i32, %c0_i32_0 : i32, i32
  }
  func.func @transform_1(%arg0: i32) -> (i32, i32) {
    %c0_i32 = arith.constant 0 : i32
    %c0_i32_0 = arith.constant 0 : i32
    %c0_i32_1 = arith.constant 0 : i32
    return %c0_i32, %c0_i32_0 : i32, i32
  }
  func.func @transform_2(%arg0: i32) -> (i32, i32) {
    %c0_i32 = arith.constant 0 : i32
    %c0_i32_0 = arith.constant 0 : i32
    %c0_i32_1 = arith.constant 0 : i32
    return %c0_i32, %c0_i32_0 : i32, i32
  }
  func.func @transform_3(%arg0: i32) -> (i32, i32) {
    %c0_i32 = arith.constant 0 : i32
    %c0_i32_0 = arith.constant 0 : i32
    %c0_i32_1 = arith.constant 0 : i32
    return %c0_i32, %c0_i32_0 : i32, i32
  }
  func.func @transform_4(%arg0: i32) -> (i32, i32) {
    %c0_i32 = arith.constant 0 : i32
    %c0_i32_0 = arith.constant 0 : i32
    %c0_i32_1 = arith.constant 0 : i32
    return %c0_i32, %c0_i32_0 : i32, i32
  }
  func.func @transform_5(%arg0: i32) -> (i32, i32) {
    %c0_i32 = arith.constant 0 : i32
    %c0_i32_0 = arith.constant 0 : i32
    %c0_i32_1 = arith.constant 0 : i32
    return %c0_i32, %c0_i32_0 : i32, i32
  }
  func.func @transform_6(%arg0: i32) -> (i32, i32) {
    %c0_i32 = arith.constant 0 : i32
    %c0_i32_0 = arith.constant 0 : i32
    return %arg0, %c0_i32 : i32, i32
  }
}

</mosaic_0001>

<bundles_post_ra>
// kernel: tpu_custom_call.1
= control target key start
LH: loop header
LB: loop body
LE: loop exit
PB: predicated region body
PF: predicated region fallthrough
CT: control target
= control target key end

     0   :  { %11 = vsyncpa [#allocation4], 0  ;;  %s3032_s0 = inlined_call_operand.hbm [shape: f32[128,128], index: 0, kind: input, shape index: {}]   ;;  %s3033_s1 = inlined_call_operand.hbm [shape: f32[128,128], index: 1, kind: input, shape index: {}]   ;;  %s3034_s2 = inlined_call_operand.hbm [shape: f32[128,384], index: 2, kind: input, shape index: {}]   ;;  %s3035_s3 = inlined_call_operand.hbm [shape: f32[128,384], index: 3, kind: input, shape index: {}]   ;;  %s3036_s4 = inlined_call_operand.hbm [shape: f32[128,384], index: 4, kind: input, shape index: {}]   ;;  %s3037_s5 = inlined_call_operand.vmem [shape: f32[1,384], index: 5, kind: input, shape index: {}]   ;;  %s3038_s6 = inlined_call_operand.hbm [shape: f32[128,384], index: 6, kind: output, shape index: {}]  }
   0x1   :  { %12 = vsyncpa [#allocation7], 0 }
   0x2   :  { %13 = vsyncpa [#allocation10], 0 }
   0x3   :  { %14 = vsyncpa [#allocation5], 0  ;;  %s2332_s21 = smov [#allocation6]  }
   0x4   :  { %s32_s22 = sshll.u32 %s2332_s21, 4  ;;  %s33_s22 = int_to_ptr.vmem [resolvable:$true] %s32_s22 }
   0x5   :  { %s2212_s23 = scalar_lea.vmem %s33_s22, 2048  ;;  %p2217_p1 = scmp.lt.s32.totalorder %s33_s22, %s33_s22 }
   0x6   :  { %p2213_p0 = scmp.ne.s32.totalorder %s33_s22, %s2212_s23  ;;  %p2218_p2 = scmp.lt.s32.totalorder %s2212_s23, %s2212_s23 }
   0x8   :  { %p2219_p3 = por %p2218_p2, %p2217_p1 }
   0xa   :  { %p2220_p4 = pnand %p2219_p3, %p2213_p0 }
   0xc   :  { %2223 = shalt.err (!%p2220_p4)
}
   0xd   :  { %s2333_s24 = smov 128   ;;  %s2334_s25 = smov 8  }
   0xe   :  { %38 = dma.hbm_to_vmem [thread:$0]  %s3033_s1, 2048, %s33_s22, [#allocation7], %s2333_s24, %s2333_s24, %s2334_s25  }
   0xf   :  { %s2335_s28 = smov [#allocation9]   ;;  %s2336_s30 = smov [#allocation3]  }
  0x10   :  { %s56_s29 = sshll.u32 %s2335_s28, 4  ;;  %s20_s7 = sshll.u32 %s2336_s30, 4  ;;  %s57_s29 = int_to_ptr.vmem [resolvable:$true] %s56_s29  ;;  %s21_s7 = int_to_ptr.vmem [resolvable:$true] %s20_s7 }
  0x11   :  { %s2232_s8 = scalar_lea.vmem %s57_s29, 6144  ;;  %p2237_p6 = scmp.lt.s32.totalorder %s57_s29, %s57_s29 }
  0x12   :  { %p2233_p5 = scmp.ne.s32.totalorder %s57_s29, %s2232_s8  ;;  %p2238_p7 = scmp.lt.s32.totalorder %s2232_s8, %s2232_s8 }
  0x14   :  { %p2239_p8 = por %p2238_p7, %p2237_p6 }
  0x16   :  { %p2240_p9 = pnand %p2239_p8, %p2233_p5 }
  0x18   :  { %2243 = shalt.err (!%p2240_p9)
}
  0x19   :  { %s2337_s9 = smov 384   ;;  %s2338_s10 = smov 24  }
  0x1a   :  { %62 = dma.hbm_to_vmem [thread:$0]  %s3035_s3, 6144, %s57_s29, [#allocation10], %s2337_s9, %s2337_s9, %s2338_s10  }
  0x1b   :  { %s2252_s1 = scalar_lea.vmem %s21_s7, 2048  ;;  %p2257_p11 = scmp.lt.s32.totalorder %s21_s7, %s21_s7 }
  0x1c   :  { %p2253_p10 = scmp.ne.s32.totalorder %s21_s7, %s2252_s1  ;;  %p2258_p12 = scmp.lt.s32.totalorder %s2252_s1, %s2252_s1 }
  0x1e   :  { %p2259_p13 = por %p2258_p12, %p2257_p11 }
  0x20   :  { %p2260_p0 = pnand %p2259_p13, %p2253_p10 }
  0x22   :  { %2263 = shalt.err (!%p2260_p0)
}
  0x23   :  { %26 = dma.hbm_to_vmem [thread:$0]  %s3032_s0, 2048, %s21_s7, [#allocation4], %s2333_s24, %s2333_s24, %s2334_s25  }
  0x24   :  { %s2339_s15 = smov [#allocation8]   ;;  %s2340_s17 = smov [#allocation11]  }
  0x25   :  { %s44_s16 = sshll.u32 %s2339_s15, 4  ;;  %s68_s18 = sshll.u32 %s2340_s17, 4  ;;  %s45_s16 = int_to_ptr.vmem [resolvable:$true] %s44_s16  ;;  %s69_s18 = int_to_ptr.vmem [resolvable:$true] %s68_s18 }
  0x26   :  { %s2272_s19 = scalar_lea.vmem %s45_s16, 6144  ;;  %p2277_p2 = scmp.lt.s32.totalorder %s45_s16, %s45_s16 }
  0x27   :  { %p2273_p1 = scmp.ne.s32.totalorder %s45_s16, %s2272_s19  ;;  %p2278_p3 = scmp.lt.s32.totalorder %s2272_s19, %s2272_s19 }
  0x29   :  { %p2279_p4 = por %p2278_p3, %p2277_p2 }
  0x2b   :  { %p2280_p5 = pnand %p2279_p4, %p2273_p1 }
  0x2d   :  { %2283 = shalt.err (!%p2280_p5)
}
  0x2e   :  { %50 = dma.hbm_to_vmem [thread:$0]  %s3034_s2, 6144, %s45_s16, [#allocation7], %s2337_s9, %s2337_s9, %s2338_s10  }
  0x2f   :  { %s2292_s0 = scalar_lea.vmem %s69_s18, 6144  ;;  %p2297_p7 = scmp.lt.s32.totalorder %s69_s18, %s69_s18 }
  0x30   :  { %p2293_p6 = scmp.ne.s32.totalorder %s69_s18, %s2292_s0  ;;  %p2298_p8 = scmp.lt.s32.totalorder %s2292_s0, %s2292_s0 }
  0x32   :  { %p2299_p9 = por %p2298_p8, %p2297_p7 }
  0x34   :  { %p2300_p10 = pnand %p2299_p9, %p2293_p6 }
  0x36   :  { %2303 = shalt.err (!%p2300_p10)
}
  0x37   :  { %74 = dma.hbm_to_vmem [thread:$0]  %s3036_s4, 6144, %s69_s18, [#allocation10], %s2337_s9, %s2337_s9, %s2338_s10  }
  0x38   :  { %2324 = dma.done.wait [#allocation4], 2048  }
  0x39   :  { %2325 = vsyncadd [#allocation4], 4294965248 }
  0x3a   :  { %2326 = dma.done.wait [#allocation7], 8192  }
  0x3b   :  { %2327 = vsyncadd [#allocation7], 4294959104 }
  0x3c   :  { %2328 = dma.done.wait [#allocation10], 12288  }
  0x3d   :  { %2329 = vsyncadd [#allocation10], 4294955008  ;;  %v2402_v0 = vld [vmem:[#allocation6 + $0x78] sm:$0xff]  ;;  %v2404_v1 = vld [vmem:[#allocation6 + $0x70] sm:$0xff] }
  0x3e   :  { %1904 = vmatprep.subr.mxu0 %v2402_v0  ;;  %v2408_v2 = vld [vmem:[#allocation6 + $0x68] sm:$0xff]  ;;  %v2412_v3 = vld [vmem:[#allocation6 + $0x60] sm:$0xff]  ;;  %v2416_v5 = vld [vmem:[#allocation6 + $0x58] sm:$0xff] }
  0x3f   :  { %1905 = vmatpush3.msra.mxu0 %v2402_v0  ;;  %v96_v4 = vld [vmem:[#allocation3] sm:$0xff]  ;;  %v2420_v6 = vld [vmem:[#allocation6 + $0x50] sm:$0xff]  ;;  %v2424_v7 = vld [vmem:[#allocation6 + $0x48] sm:$0xff] }
  0x40   :  { %1906 = vmatprep.subr.mxu0 %v2404_v1  ;;  %1936 = vmatprep.mubr.f32.mxu0 %v96_v4  ;;  %v2428_v8 = vld [vmem:[#allocation6 + $0x40] sm:$0xff]  ;;  %v2432_v9 = vld [vmem:[#allocation6 + $0x38] sm:$0xff]  ;;  %v2436_v10 = vld [vmem:[#allocation6 + $0x30] sm:$0xff] }
  0x41   :  { %1907 = vmatpush3.msra.mxu0 %v2404_v1  ;;  %1992 = vmatprep.mubr.f32.mxu1 %v96_v4  ;;  %v2440_v11 = vld [vmem:[#allocation6 + $0x28] sm:$0xff]  ;;  %v2444_v12 = vld [vmem:[#allocation6 + $0x20] sm:$0xff]  ;;  %v2448_v13 = vld [vmem:[#allocation6 + $0x18] sm:$0xff]  ;;  %v2341_v4 = vmov 0.0  }
  0x42   :  { %1908 = vmatprep.subr.mxu0 %v2408_v2  ;;  %v2452_v14 = vld [vmem:[#allocation6 + $0x10] sm:$0xff]  ;;  %v2456_v15 = vld [vmem:[#allocation6 + $0x8] sm:$0xff]  ;;  %v2460_v16 = vld [vmem:[#allocation6] sm:$0xff] }
  0x43   :  { %1909 = vmatpush3.msra.mxu0 %v2408_v2  ;;  %v2464_v17 = vld [vmem:[#allocation3 + $0x8] sm:$0xff]  ;;  %v596_v18 = vld [vmem:[#allocation9 + $0x170] sm:$0xff]  ;;  %v593_v21 = vld [vmem:[#allocation9 + $0x158] sm:$0xff] }
  0x44   :  { %1910 = vmatprep.subr.mxu0 %v2412_v3  ;;  %v2467_v19 = vld [vmem:[#allocation3 + $0x10] sm:$0xff]  ;;  %v595_v20 = vld [vmem:[#allocation9 + $0x168] sm:$0xff]  ;;  %v2472_v23 = vld [vmem:[#allocation3 + $0x18] sm:$0xff] }
  0x45   :  { %1911 = vmatpush3.msra.mxu0 %v2412_v3  ;;  %v592_v22 = vld [vmem:[#allocation9 + $0x150] sm:$0xff]  ;;  %v590_v24 = vld [vmem:[#allocation9 + $0x140] sm:$0xff]  ;;  %v589_v26 = vld [vmem:[#allocation9 + $0x138] sm:$0xff] }
  0x46   :  { %1912 = vmatprep.subr.mxu0 %v2416_v5  ;;  %v2474_v25 = vld [vmem:[#allocation3 + $0x20] sm:$0xff]  ;;  %v587_v27 = vld [vmem:[#allocation9 + $0x128] sm:$0xff]  ;;  %v584_v30 = vld [vmem:[#allocation9 + $0x110] sm:$0xff] }
  0x47   :  { %1913 = vmatpush3.msra.mxu0 %v2416_v5  ;;  %v586_v28 = vld [vmem:[#allocation9 + $0x120] sm:$0xff]  ;;  %v2478_v29 = vld [vmem:[#allocation3 + $0x28] sm:$0xff]  ;;  %v2480_v31 = vld [vmem:[#allocation3 + $0x30] sm:$0xff] }
  0x48   :  { %1914 = vmatprep.subr.mxu0 %v2420_v6  ;;  %v583_v32 = vld [vmem:[#allocation9 + $0x108] sm:$0xff]  ;;  %v581_v33 = vld [vmem:[#allocation9 + $0xf8] sm:$0xff]  ;;  %v580_v34 = vld [vmem:[#allocation9 + $0xf0] sm:$0xff] }
  0x49   :  { %1915 = vmatpush3.msra.mxu0 %v2420_v6  ;;  %v2484_v35 = vld [vmem:[#allocation3 + $0x38] sm:$0xff]  ;;  %v578_v36 = vld [vmem:[#allocation9 + $0xe0] sm:$0xff]  ;;  %v575_v39 = vld [vmem:[#allocation9 + $0xc8] sm:$0xff] }
  0x4a   :  { %1916 = vmatprep.subr.mxu0 %v2424_v7  ;;  %v2486_v37 = vld [vmem:[#allocation3 + $0x40] sm:$0xff]  ;;  %v577_v38 = vld [vmem:[#allocation9 + $0xd8] sm:$0xff]  ;;  %v2490_v41 = vld [vmem:[#allocation3 + $0x48] sm:$0xff] }
  0x4b   :  { %1917 = vmatpush3.msra.mxu0 %v2424_v7  ;;  %v574_v40 = vld [vmem:[#allocation9 + $0xc0] sm:$0xff]  ;;  %v572_v42 = vld [vmem:[#allocation9 + $0xb0] sm:$0xff]  ;;  %v571_v44 = vld [vmem:[#allocation9 + $0xa8] sm:$0xff] }
  0x4c   :  { %1918 = vmatprep.subr.mxu0 %v2428_v8  ;;  %v2492_v43 = vld [vmem:[#allocation3 + $0x50] sm:$0xff]  ;;  %v569_v45 = vld [vmem:[#allocation9 + $0x98] sm:$0xff]  ;;  %v566_v48 = vld [vmem:[#allocation9 + $0x80] sm:$0xff] }
  0x4d   :  { %1919 = vmatpush3.msra.mxu0 %v2428_v8  ;;  %v568_v46 = vld [vmem:[#allocation9 + $0x90] sm:$0xff]  ;;  %v2496_v47 = vld [vmem:[#allocation3 + $0x58] sm:$0xff]  ;;  %v2498_v49 = vld [vmem:[#allocation3 + $0x60] sm:$0xff] }
  0x4e   :  { %1920 = vmatprep.subr.mxu0 %v2432_v9  ;;  %v565_v50 = vld [vmem:[#allocation9 + $0x78] sm:$0xff]  ;;  %v563_v51 = vld [vmem:[#allocation9 + $0x68] sm:$0xff]  ;;  %v562_v52 = vld [vmem:[#allocation9 + $0x60] sm:$0xff] }
  0x4f   :  { %1921 = vmatpush3.msra.mxu0 %v2432_v9  ;;  %v2502_v53 = vld [vmem:[#allocation3 + $0x68] sm:$0xff]  ;;  %v560_v54 = vld [vmem:[#allocation9 + $0x50] sm:$0xff]  ;;  %v557_v57 = vld [vmem:[#allocation9 + $0x38] sm:$0xff] }
  0x50   :  { %1922 = vmatprep.subr.mxu0 %v2436_v10  ;;  %v2504_v55 = vld [vmem:[#allocation3 + $0x70] sm:$0xff]  ;;  %v559_v56 = vld [vmem:[#allocation9 + $0x48] sm:$0xff]  ;;  %v2508_v59 = vld [vmem:[#allocation3 + $0x78] sm:$0xff] }
  0x51   :  { %1923 = vmatpush3.msra.mxu0 %v2436_v10  ;;  %v556_v58 = vld [vmem:[#allocation9 + $0x30] sm:$0xff]  ;;  %v554_v60 = vld [vmem:[#allocation9 + $0x20] sm:$0xff]  ;;  %v553_v61 = vld [vmem:[#allocation9 + $0x18] sm:$0xff] }
  0x52   :  { %1924 = vmatprep.subr.mxu0 %v2440_v11  ;;  %v551_v62 = vld [vmem:[#allocation9 + $0x8] sm:$0xff]  ;;  %v550_v63 = vld [vmem:[#allocation9] sm:$0xff] }
  0x53   :  { %1925 = vmatpush3.msra.mxu0 %v2440_v11 }
  0x54   :  { %1926 = vmatprep.subr.mxu0 %v2444_v12 }
  0x55   :  { %1927 = vmatpush3.msra.mxu0 %v2444_v12 }
  0x56   :  { %1928 = vmatprep.subr.mxu0 %v2448_v13 }
  0x57   :  { %1929 = vmatpush3.msra.mxu0 %v2448_v13 }
  0x58   :  { %1930 = vmatprep.subr.mxu0 %v2452_v14 }
  0x59   :  { %1931 = vmatpush3.msra.mxu0 %v2452_v14 }
  0x5a   :  { %1932 = vmatprep.subr.mxu0 %v2456_v15 }
  0x5b   :  { %1933 = vmatpush3.msra.mxu0 %v2456_v15 }
  0x5c   :  { %1934 = vmatprep.subr.mxu0 %v2460_v16 }
  0x5d   :  { %1935 = vmatpush3.msra.mxu0 %v2460_v16 }
  0x5e   :  { %1937 = vmatmul.mubr.f32.vlgmr.msra.gmra.mxu0 %v2464_v17  ;;  %598 = vmatprep.subr.mxu0 %v596_v18  ;;  %v549_v18 = vld [vmem:[#allocation8 + $0x178] sm:$0xff] }
  0x5f   :  { %1939 = vmatprep.mubr.f32.mxu0 %v2467_v19  ;;  %599 = vmatpush1.msra.mxu0 %v595_v20 }
  0x60   :  { %600 = vmatprep.subr.mxu0 %v593_v21 }
  0x61   :  { %601 = vmatpush1.msra.mxu0 %v592_v22  ;;  %v546_v22 = vld [vmem:[#allocation8 + $0x160] sm:$0xff] }
  0x62   :  { %1940 = vmatmul.mubr.f32.gmra.mxu0 %v2472_v23  ;;  %602 = vmatprep.subr.mxu0 %v590_v24 }
  0x63   :  { %1942 = vmatprep.mubr.f32.mxu0 %v2474_v25  ;;  %603 = vmatpush1.msra.mxu0 %v589_v26  ;;  %v543_v26 = vld [vmem:[#allocation8 + $0x148] sm:$0xff] }
  0x64   :  { %604 = vmatprep.subr.mxu0 %v587_v27 }
  0x65   :  { %605 = vmatpush1.msra.mxu0 %v586_v28  ;;  %v540_v28 = vld [vmem:[#allocation8 + $0x130] sm:$0xff] }
  0x66   :  { %1943 = vmatmul.mubr.f32.gmra.mxu0 %v2478_v29  ;;  %606 = vmatprep.subr.mxu0 %v584_v30 }
  0x67   :  { %1945 = vmatprep.mubr.f32.mxu0 %v2480_v31  ;;  %607 = vmatpush1.msra.mxu0 %v583_v32  ;;  %v537_v32 = vld [vmem:[#allocation8 + $0x118] sm:$0xff] }
  0x68   :  { %608 = vmatprep.subr.mxu0 %v581_v33 }
  0x69   :  { %609 = vmatpush1.msra.mxu0 %v580_v34  ;;  %v534_v34 = vld [vmem:[#allocation8 + $0x100] sm:$0xff] }
  0x6a   :  { %1946 = vmatmul.mubr.f32.gmra.mxu0 %v2484_v35  ;;  %610 = vmatprep.subr.mxu0 %v578_v36 }
  0x6b   :  { %1948 = vmatprep.mubr.f32.mxu0 %v2486_v37  ;;  %611 = vmatpush1.msra.mxu0 %v577_v38  ;;  %v531_v38 = vld [vmem:[#allocation8 + $0xe8] sm:$0xff] }
  0x6c   :  { %612 = vmatprep.subr.mxu0 %v575_v39 }
  0x6d   :  { %613 = vmatpush1.msra.mxu0 %v574_v40  ;;  %v528_v40 = vld [vmem:[#allocation8 + $0xd0] sm:$0xff] }
  0x6e   :  { %1949 = vmatmul.mubr.f32.gmra.mxu0 %v2490_v41  ;;  %614 = vmatprep.subr.mxu0 %v572_v42 }
  0x6f   :  { %1951 = vmatprep.mubr.f32.mxu0 %v2492_v43  ;;  %615 = vmatpush1.msra.mxu0 %v571_v44  ;;  %v525_v44 = vld [vmem:[#allocation8 + $0xb8] sm:$0xff] }
  0x70   :  { %616 = vmatprep.subr.mxu0 %v569_v45 }
  0x71   :  { %617 = vmatpush1.msra.mxu0 %v568_v46  ;;  %v522_v46 = vld [vmem:[#allocation8 + $0xa0] sm:$0xff] }
  0x72   :  { %1952 = vmatmul.mubr.f32.gmra.mxu0 %v2496_v47  ;;  %618 = vmatprep.subr.mxu0 %v566_v48 }
  0x73   :  { %1954 = vmatprep.mubr.f32.mxu0 %v2498_v49  ;;  %619 = vmatpush1.msra.mxu0 %v565_v50  ;;  %v519_v50 = vld [vmem:[#allocation8 + $0x88] sm:$0xff] }
  0x74   :  { %620 = vmatprep.subr.mxu0 %v563_v51 }
  0x75   :  { %621 = vmatpush1.msra.mxu0 %v562_v52  ;;  %v516_v52 = vld [vmem:[#allocation8 + $0x70] sm:$0xff] }
  0x76   :  { %1955 = vmatmul.mubr.f32.gmra.mxu0 %v2502_v53  ;;  %622 = vmatprep.subr.mxu0 %v560_v54 }
  0x77   :  { %1957 = vmatprep.mubr.f32.mxu0 %v2504_v55  ;;  %623 = vmatpush1.msra.mxu0 %v559_v56  ;;  %v513_v56 = vld [vmem:[#allocation8 + $0x58] sm:$0xff] }
  0x78   :  { %624 = vmatprep.subr.mxu0 %v557_v57 }
  0x79   :  { %625 = vmatpush1.msra.mxu0 %v556_v58  ;;  %v510_v58 = vld [vmem:[#allocation8 + $0x40] sm:$0xff] }
  0x7a   :  { %1958 = vmatmul.mubr.f32.gmra.mxu0 %v2508_v59  ;;  %626 = vmatprep.subr.mxu0 %v554_v60 }
  0x7b   :  { %627 = vmatpush1.msra.mxu0 %v553_v61  ;;  %662 = vmatprep.mubr.f32.mxu0 %v2341_v4 }
  0x7c   :  { %628 = vmatprep.subr.mxu0 %v551_v62  ;;  %v507_v62 = vld [vmem:[#allocation8 + $0x28] sm:$0xff] }
  0x7d   :  { %629 = vmatpush1.msra.mxu0 %v550_v63  ;;  %v504_v63 = vld [vmem:[#allocation8 + $0x10] sm:$0xff] }
  0x7e   :  { %2072 = vmatprep.subr.mxu0 %v549_v18 }
 0x11e   :  { %v2512_v20 = vpop.f32.mrf.mxu0 }
 0x120   :  { %v2514_v21 = vpop.f32.mrf.mxu0 }
 0x121   :  { %663 = vmatmul.mubr.f32.vlgmr.msra.gmra.mxu0 %v2514_v21 }
 0x122   :  { %v2517_v24 = vpop.f32.mrf.mxu0  ;;  %668 = vmatprep.mubr.f32.mxu0 %v2341_v4  ;;  %2073 = vmatpush3.msra.mxu0 %v549_v18  ;;  %v597_v18 = vld [vmem:[#allocation9 + $0x178] sm:$0xff] }
 0x123   :  { %2074 = vmatprep.subr.mxu0 %v546_v22 }
 0x124   :  { %v2520_v27 = vpop.f32.mrf.mxu0  ;;  %2075 = vmatpush3.msra.mxu0 %v546_v22  ;;  %v594_v22 = vld [vmem:[#allocation9 + $0x160] sm:$0xff] }
 0x125   :  { %669 = vmatmul.mubr.f32.gmra.mxu0 %v2512_v20  ;;  %2076 = vmatprep.subr.mxu0 %v543_v26 }
 0x126   :  { %v2523_v30 = vpop.f32.mrf.mxu0  ;;  %674 = vmatprep.mubr.f32.mxu0 %v2341_v4  ;;  %2077 = vmatpush3.msra.mxu0 %v543_v26  ;;  %v591_v26 = vld [vmem:[#allocation9 + $0x148] sm:$0xff] }
 0x127   :  { %2078 = vmatprep.subr.mxu0 %v540_v28 }
 0x128   :  { %v2526_v33 = vpop.f32.mrf.mxu0  ;;  %2079 = vmatpush3.msra.mxu0 %v540_v28  ;;  %v588_v28 = vld [vmem:[#allocation9 + $0x130] sm:$0xff] }
 0x129   :  { %675 = vmatmul.mubr.f32.gmra.mxu0 %v2520_v27  ;;  %2080 = vmatprep.subr.mxu0 %v537_v32 }
 0x12a   :  { %v2529_v36 = vpop.f32.mrf.mxu0  ;;  %680 = vmatprep.mubr.f32.mxu0 %v2341_v4  ;;  %2081 = vmatpush3.msra.mxu0 %v537_v32  ;;  %v585_v32 = vld [vmem:[#allocation9 + $0x118] sm:$0xff] }
 0x12b   :  { %2082 = vmatprep.subr.mxu0 %v534_v34 }
 0x12c   :  { %v2532_v39 = vpop.f32.mrf.mxu0  ;;  %2083 = vmatpush3.msra.mxu0 %v534_v34  ;;  %v1250_v34 = vld [vmem:[#allocation11 + $0x140] sm:$0xff] }
 0x12d   :  { %681 = vmatmul.mubr.f32.gmra.mxu0 %v2517_v24  ;;  %2084 = vmatprep.subr.mxu0 %v531_v38 }
 0x12e   :  { %v2535_v42 = vpop.f32.mrf.mxu0  ;;  %686 = vmatprep.mubr.f32.mxu0 %v2341_v4  ;;  %2085 = vmatpush3.msra.mxu0 %v531_v38  ;;  %v527_v38 = vld [vmem:[#allocation8 + $0xc8] sm:$0xff] }
 0x12f   :  { %2086 = vmatprep.subr.mxu0 %v528_v40 }
 0x130   :  { %v2538_v45 = vpop.f32.mrf.mxu0  ;;  %2087 = vmatpush3.msra.mxu0 %v528_v40  ;;  %v1249_v40 = vld [vmem:[#allocation11 + $0x138] sm:$0xff] }
 0x131   :  { %687 = vmatmul.mubr.f32.gmra.mxu0 %v2526_v33  ;;  %2088 = vmatprep.subr.mxu0 %v525_v44 }
 0x132   :  { %v2541_v48 = vpop.f32.mrf.mxu0  ;;  %692 = vmatprep.mubr.f32.mxu0 %v2341_v4  ;;  %2089 = vmatpush3.msra.mxu0 %v525_v44  ;;  %v526_v44 = vld [vmem:[#allocation8 + $0xc0] sm:$0xff] }
 0x133   :  { %2090 = vmatprep.subr.mxu0 %v522_v46 }
 0x134   :  { %v2544_v51 = vpop.f32.mrf.mxu0  ;;  %2091 = vmatpush3.msra.mxu0 %v522_v46  ;;  %v1247_v46 = vld [vmem:[#allocation11 + $0x128] sm:$0xff] }
 0x135   :  { %693 = vmatmul.mubr.f32.gmra.mxu0 %v2523_v30  ;;  %2092 = vmatprep.subr.mxu0 %v519_v50 }
 0x136   :  { %v2547_v54 = vpop.f32.mrf.mxu0  ;;  %698 = vmatprep.mubr.f32.mxu0 %v2341_v4  ;;  %2093 = vmatpush3.msra.mxu0 %v519_v50  ;;  %v521_v50 = vld [vmem:[#allocation8 + $0x98] sm:$0xff] }
 0x137   :  { %2094 = vmatprep.subr.mxu0 %v516_v52 }
 0x138   :  { %v2550_v57 = vpop.f32.mrf.mxu0  ;;  %2095 = vmatpush3.msra.mxu0 %v516_v52  ;;  %v1246_v52 = vld [vmem:[#allocation11 + $0x120] sm:$0xff] }
 0x139   :  { %699 = vmatmul.mubr.f32.gmra.mxu0 %v2532_v39  ;;  %2096 = vmatprep.subr.mxu0 %v513_v56 }
 0x13a   :  { %v2553_v60 = vpop.f32.mrf.mxu0  ;;  %704 = vmatprep.mubr.f32.mxu0 %v2341_v4  ;;  %2097 = vmatpush3.msra.mxu0 %v513_v56  ;;  %v520_v56 = vld [vmem:[#allocation8 + $0x90] sm:$0xff] }
 0x13b   :  { %1960 = vmatprep.subr.mxu1 %v2553_v60  ;;  %2098 = vmatprep.subr.mxu0 %v510_v58 }
 0x13c   :  { %v2557_v61 = vpop.f32.mrf.mxu0  ;;  %1961 = vmatpush3.msra.mxu1 %v2553_v60  ;;  %2099 = vmatpush3.msra.mxu0 %v510_v58  ;;  %v1244_v58 = vld [vmem:[#allocation11 + $0x110] sm:$0xff] }
 0x13d   :  { %1962 = vmatprep.subr.mxu1 %v2557_v61  ;;  %705 = vmatmul.mubr.f32.gmra.mxu0 %v2529_v36 }
 0x13e   :  { %1963 = vmatpush3.msra.mxu1 %v2557_v61  ;;  %710 = vmatprep.mubr.f32.mxu0 %v2341_v4 }
 0x13f   :  { %1964 = vmatprep.subr.mxu1 %v2547_v54  ;;  %2100 = vmatprep.subr.mxu0 %v507_v62 }
 0x140   :  { %1965 = vmatpush3.msra.mxu1 %v2547_v54  ;;  %2101 = vmatpush3.msra.mxu0 %v507_v62  ;;  %v515_v62 = vld [vmem:[#allocation8 + $0x68] sm:$0xff] }
 0x141   :  { %1966 = vmatprep.subr.mxu1 %v2550_v57  ;;  %711 = vmatmul.mubr.f32.gmra.mxu0 %v2538_v45 }
 0x142   :  { %1967 = vmatpush3.msra.mxu1 %v2550_v57  ;;  %716 = vmatprep.mubr.f32.mxu0 %v2341_v4 }
 0x143   :  { %1968 = vmatprep.subr.mxu1 %v2541_v48  ;;  %2102 = vmatprep.subr.mxu0 %v504_v63 }
 0x144   :  { %1969 = vmatpush3.msra.mxu1 %v2541_v48  ;;  %2103 = vmatpush3.msra.mxu0 %v504_v63  ;;  %v1243_v63 = vld [vmem:[#allocation11 + $0x108] sm:$0xff] }
 0x145   :  { %1970 = vmatprep.subr.mxu1 %v2544_v51  ;;  %717 = vmatmul.mubr.f32.gmra.mxu0 %v2535_v42 }
 0x146   :  { %1971 = vmatpush3.msra.mxu1 %v2544_v51  ;;  %722 = vmatprep.mubr.f32.mxu0 %v2341_v4 }
 0x147   :  { %1972 = vmatprep.subr.mxu1 %v2535_v42 }
 0x148   :  { %1973 = vmatpush3.msra.mxu1 %v2535_v42 }
 0x149   :  { %1974 = vmatprep.subr.mxu1 %v2538_v45  ;;  %723 = vmatmul.mubr.f32.gmra.mxu0 %v2544_v51 }
 0x14a   :  { %1975 = vmatpush3.msra.mxu1 %v2538_v45  ;;  %728 = vmatprep.mubr.f32.mxu0 %v2341_v4 }
 0x14b   :  { %1976 = vmatprep.subr.mxu1 %v2529_v36 }
 0x14c   :  { %1977 = vmatpush3.msra.mxu1 %v2529_v36 }
 0x14d   :  { %1978 = vmatprep.subr.mxu1 %v2532_v39  ;;  %729 = vmatmul.mubr.f32.gmra.mxu0 %v2541_v48 }
 0x14e   :  { %1979 = vmatpush3.msra.mxu1 %v2532_v39  ;;  %734 = vmatprep.mubr.f32.mxu0 %v2341_v4 }
 0x14f   :  { %1980 = vmatprep.subr.mxu1 %v2523_v30 }
 0x150   :  { %1981 = vmatpush3.msra.mxu1 %v2523_v30 }
 0x151   :  { %1982 = vmatprep.subr.mxu1 %v2526_v33  ;;  %735 = vmatmul.mubr.f32.gmra.mxu0 %v2550_v57 }
 0x152   :  { %1983 = vmatpush3.msra.mxu1 %v2526_v33  ;;  %740 = vmatprep.mubr.f32.mxu0 %v2341_v4 }
 0x153   :  { %1984 = vmatprep.subr.mxu1 %v2517_v24 }
 0x154   :  { %1985 = vmatpush3.msra.mxu1 %v2517_v24 }
 0x155   :  { %1986 = vmatprep.subr.mxu1 %v2520_v27  ;;  %741 = vmatmul.mubr.f32.gmra.mxu0 %v2547_v54 }
 0x156   :  { %1987 = vmatpush3.msra.mxu1 %v2520_v27  ;;  %746 = vmatprep.mubr.f32.mxu0 %v2341_v4 }
 0x157   :  { %1988 = vmatprep.subr.mxu1 %v2512_v20 }
 0x158   :  { %1989 = vmatpush3.msra.mxu1 %v2512_v20 }
 0x159   :  { %1990 = vmatprep.subr.mxu1 %v2514_v21  ;;  %747 = vmatmul.mubr.f32.gmra.mxu0 %v2557_v61 }
 0x15a   :  { %1991 = vmatpush3.msra.mxu1 %v2514_v21  ;;  %752 = vmatprep.mubr.f32.mxu0 %v2341_v4 }
 0x15b   :  { %1993 = vmatmul.mubr.f32.vlgmr.msra.gmra.mxu1 %v2464_v17  ;;  %2016 = vmatprep.subr.mxu1 %v597_v18  ;;  %v582_v17 = vld [vmem:[#allocation9 + $0x100] sm:$0xff] }
 0x15c   :  { %2017 = vmatpush3.msra.mxu1 %v597_v18  ;;  %1995 = vmatprep.mubr.f32.mxu1 %v2467_v19  ;;  %v579_v19 = vld [vmem:[#allocation9 + $0xe8] sm:$0xff]  ;;  %v514_v18 = vld [vmem:[#allocation8 + $0x60] sm:$0xff] }
 0x15d   :  { %753 = vmatmul.mubr.f32.gmra.mxu0 %v2553_v60  ;;  %2018 = vmatprep.subr.mxu1 %v594_v22 }
 0x15e   :  { %2019 = vmatpush3.msra.mxu1 %v594_v22  ;;  %2104 = vmatprep.mubr.f32.mxu0 %v2460_v16  ;;  %v1241_v22 = vld [vmem:[#allocation11 + $0xf8] sm:$0xff] }
 0x15f   :  { %1996 = vmatmul.mubr.f32.gmra.mxu1 %v2472_v23  ;;  %2020 = vmatprep.subr.mxu1 %v591_v26  ;;  %v576_v23 = vld [vmem:[#allocation9 + $0xd0] sm:$0xff] }
 0x160   :  { %2021 = vmatpush3.msra.mxu1 %v591_v26  ;;  %1998 = vmatprep.mubr.f32.mxu1 %v2474_v25  ;;  %v573_v25 = vld [vmem:[#allocation9 + $0xb8] sm:$0xff] }
 0x161   :  { %2022 = vmatprep.subr.mxu1 %v588_v28  ;;  %2105 = vmatmul.mubr.f32.vlgmr.msra.gmra.mxu0 %v2456_v15  ;;  %v509_v26 = vld [vmem:[#allocation8 + $0x38] sm:$0xff] }
 0x162   :  { %2023 = vmatpush3.msra.mxu1 %v588_v28  ;;  %2107 = vmatprep.mubr.f32.mxu0 %v2452_v14  ;;  %v1240_v28 = vld [vmem:[#allocation11 + $0xf0] sm:$0xff] }
 0x163   :  { %1999 = vmatmul.mubr.f32.gmra.mxu1 %v2478_v29  ;;  %2024 = vmatprep.subr.mxu1 %v585_v32  ;;  %v570_v29 = vld [vmem:[#allocation9 + $0xa0] sm:$0xff] }
 0x164   :  { %2025 = vmatpush3.msra.mxu1 %v585_v32  ;;  %2001 = vmatprep.mubr.f32.mxu1 %v2480_v31  ;;  %v567_v31 = vld [vmem:[#allocation9 + $0x88] sm:$0xff]  ;;  %v508_v32 = vld [vmem:[#allocation8 + $0x30] sm:$0xff] }
 0x165   :  { %2026 = vmatprep.subr.mxu1 %v582_v17  ;;  %2108 = vmatmul.mubr.f32.gmra.mxu0 %v2448_v13 }
 0x166   :  { %2027 = vmatpush3.msra.mxu1 %v582_v17  ;;  %2110 = vmatprep.mubr.f32.mxu0 %v2444_v12  ;;  %v1238_v17 = vld [vmem:[#allocation11 + $0xe0] sm:$0xff] }
 0x167   :  { %2002 = vmatmul.mubr.f32.gmra.mxu1 %v2484_v35  ;;  %2028 = vmatprep.subr.mxu1 %v579_v19  ;;  %v564_v35 = vld [vmem:[#allocation9 + $0x70] sm:$0xff] }
 0x168   :  { %2029 = vmatpush3.msra.mxu1 %v579_v19  ;;  %2004 = vmatprep.mubr.f32.mxu1 %v2486_v37  ;;  %v561_v37 = vld [vmem:[#allocation9 + $0x58] sm:$0xff]  ;;  %v503_v19 = vld [vmem:[#allocation8 + $0x8] sm:$0xff] }
 0x169   :  { %2030 = vmatprep.subr.mxu1 %v576_v23  ;;  %2111 = vmatmul.mubr.f32.gmra.mxu0 %v2440_v11 }
 0x16a   :  { %2031 = vmatpush3.msra.mxu1 %v576_v23  ;;  %2113 = vmatprep.mubr.f32.mxu0 %v2436_v10  ;;  %v1237_v23 = vld [vmem:[#allocation11 + $0xd8] sm:$0xff] }
 0x16b   :  { %2005 = vmatmul.mubr.f32.gmra.mxu1 %v2490_v41  ;;  %2032 = vmatprep.subr.mxu1 %v573_v25  ;;  %v558_v41 = vld [vmem:[#allocation9 + $0x40] sm:$0xff] }
 0x16c   :  { %2033 = vmatpush3.msra.mxu1 %v573_v25  ;;  %2007 = vmatprep.mubr.f32.mxu1 %v2492_v43  ;;  %v545_v43 = vld [vmem:[#allocation8 + $0x158] sm:$0xff]  ;;  %v502_v25 = vld [vmem:[#allocation8] sm:$0xff] }
 0x16d   :  { %2034 = vmatprep.subr.mxu1 %v570_v29  ;;  %2114 = vmatmul.mubr.f32.gmra.mxu0 %v2432_v9  ;;  %v552_v9 = vld [vmem:[#allocation9 + $0x10] sm:$0xff] }
 0x16e   :  { %2035 = vmatpush3.msra.mxu1 %v570_v29  ;;  %2116 = vmatprep.mubr.f32.mxu0 %v2428_v8  ;;  %v555_v8 = vld [vmem:[#allocation9 + $0x28] sm:$0xff] }
 0x16f   :  { %2008 = vmatmul.mubr.f32.gmra.mxu1 %v2496_v47  ;;  %2036 = vmatprep.subr.mxu1 %v567_v31  ;;  %v541_v47 = vld [vmem:[#allocation8 + $0x138] sm:$0xff]  ;;  %v1235_v29 = vld [vmem:[#allocation11 + $0xc8] sm:$0xff] }
 0x170   :  { %2037 = vmatpush3.msra.mxu1 %v567_v31  ;;  %2010 = vmatprep.mubr.f32.mxu1 %v2498_v49  ;;  %v1256_v49 = vld [vmem:[#allocation11 + $0x170] sm:$0xff]  ;;  %v1234_v31 = vld [vmem:[#allocation11 + $0xc0] sm:$0xff] }
 0x171   :  { %2038 = vmatprep.subr.mxu1 %v564_v35  ;;  %2117 = vmatmul.mubr.f32.gmra.mxu0 %v2424_v7  ;;  %v547_v7 = vld [vmem:[#allocation8 + $0x168] sm:$0xff] }
 0x172   :  { %2039 = vmatpush3.msra.mxu1 %v564_v35  ;;  %2119 = vmatprep.mubr.f32.mxu0 %v2420_v6  ;;  %v548_v6 = vld [vmem:[#allocation8 + $0x170] sm:$0xff] }
 0x173   :  { %2011 = vmatmul.mubr.f32.gmra.mxu1 %v2502_v53  ;;  %2040 = vmatprep.subr.mxu1 %v561_v37  ;;  %v539_v53 = vld [vmem:[#allocation8 + $0x128] sm:$0xff]  ;;  %v1232_v35 = vld [vmem:[#allocation11 + $0xb0] sm:$0xff] }
 0x174   :  { %2041 = vmatpush3.msra.mxu1 %v561_v37  ;;  %2013 = vmatprep.mubr.f32.mxu1 %v2504_v55  ;;  %v1253_v55 = vld [vmem:[#allocation11 + $0x158] sm:$0xff]  ;;  %v1248_v37 = vld [vmem:[#allocation11 + $0x130] sm:$0xff] }
 0x175   :  { %2042 = vmatprep.subr.mxu1 %v558_v41  ;;  %2120 = vmatmul.mubr.f32.gmra.mxu0 %v2416_v5  ;;  %v544_v5 = vld [vmem:[#allocation8 + $0x150] sm:$0xff] }
 0x176   :  { %2043 = vmatpush3.msra.mxu1 %v558_v41  ;;  %2122 = vmatprep.mubr.f32.mxu0 %v2412_v3  ;;  %v542_v3 = vld [vmem:[#allocation8 + $0x140] sm:$0xff]  ;;  %v1231_v41 = vld [vmem:[#allocation11 + $0xa8] sm:$0xff] }
 0x177   :  { %2014 = vmatmul.mubr.f32.gmra.mxu1 %v2508_v59  ;;  %2044 = vmatprep.subr.mxu1 %v555_v8  ;;  %v536_v59 = vld [vmem:[#allocation8 + $0x110] sm:$0xff] }
 0x178   :  { %2045 = vmatpush3.msra.mxu1 %v555_v8  ;;  %2048 = vmatprep.mubr.f32.mxu1 %v2514_v21  ;;  %v533_v21 = vld [vmem:[#allocation8 + $0xf8] sm:$0xff] }
 0x179   :  { %2046 = vmatprep.subr.mxu1 %v552_v9  ;;  %2123 = vmatmul.mubr.f32.gmra.mxu0 %v2408_v2  ;;  %v1255_v2 = vld [vmem:[#allocation11 + $0x168] sm:$0xff]  ;;  %v1229_v8 = vld [vmem:[#allocation11 + $0x98] sm:$0xff] }
 0x17a   :  { %2047 = vmatpush3.msra.mxu1 %v552_v9  ;;  %2125 = vmatprep.mubr.f32.mxu0 %v2404_v1  ;;  %v538_v1 = vld [vmem:[#allocation8 + $0x120] sm:$0xff] }
 0x17b   :  { %2049 = vmatmul.mubr.f32.vlgmr.msra.gmra.mxu1 %v2512_v20  ;;  %904 = vmatprep.subr.mxu1 %v548_v6  ;;  %v535_v20 = vld [vmem:[#allocation8 + $0x108] sm:$0xff]  ;;  %v1242_v9 = vld [vmem:[#allocation11 + $0x100] sm:$0xff]  ;;  %v1228_v6 = vld [vmem:[#allocation11 + $0x90] sm:$0xff] }
 0x17c   :  { %2051 = vmatprep.mubr.f32.mxu1 %v2520_v27  ;;  %905 = vmatpush1.msra.mxu1 %v547_v7  ;;  %v532_v27 = vld [vmem:[#allocation8 + $0xf0] sm:$0xff]  ;;  %v1226_v7 = vld [vmem:[#allocation11 + $0x80] sm:$0xff] }
 0x17d   :  { %906 = vmatprep.subr.mxu1 %v545_v43  ;;  %2126 = vmatmul.mubr.f32.gmra.mxu0 %v2402_v0  ;;  %v1252_v0 = vld [vmem:[#allocation11 + $0x150] sm:$0xff] }
 0x17e   :  { %907 = vmatpush1.msra.mxu1 %v544_v5  ;;  %1258 = vmatprep.subr.mxu0 %v1256_v49  ;;  %v1236_v43 = vld [vmem:[#allocation11 + $0xd0] sm:$0xff]  ;;  %v1225_v5 = vld [vmem:[#allocation11 + $0x78] sm:$0xff]  ;;  %v1222_v49 = vld [vmem:[#allocation11 + $0x60] sm:$0xff] }
 0x17f   :  { %2052 = vmatmul.mubr.f32.gmra.mxu1 %v2517_v24  ;;  %908 = vmatprep.subr.mxu1 %v542_v3  ;;  %v530_v24 = vld [vmem:[#allocation8 + $0xe0] sm:$0xff]  ;;  %v1223_v3 = vld [vmem:[#allocation11 + $0x68] sm:$0xff] }
 0x180   :  { %2054 = vmatprep.mubr.f32.mxu1 %v2526_v33  ;;  %909 = vmatpush1.msra.mxu1 %v541_v47  ;;  %v529_v33 = vld [vmem:[#allocation8 + $0xd8] sm:$0xff]  ;;  %v1230_v47 = vld [vmem:[#allocation11 + $0xa0] sm:$0xff] }
 0x181   :  { %910 = vmatprep.subr.mxu1 %v539_v53  ;;  %1259 = vmatpush1.msra.mxu0 %v1255_v2  ;;  %v1220_v53 = vld [vmem:[#allocation11 + $0x50] sm:$0xff] }
 0x182   :  { %911 = vmatpush1.msra.mxu1 %v538_v1  ;;  %1260 = vmatprep.subr.mxu0 %v1253_v55  ;;  %v1224_v2 = vld [vmem:[#allocation11 + $0x70] sm:$0xff]  ;;  %v1219_v1 = vld [vmem:[#allocation11 + $0x48] sm:$0xff]  ;;  %v1217_v55 = vld [vmem:[#allocation11 + $0x38] sm:$0xff] }
 0x183   :  { %2055 = vmatmul.mubr.f32.gmra.mxu1 %v2523_v30  ;;  %912 = vmatprep.subr.mxu1 %v536_v59  ;;  %v524_v30 = vld [vmem:[#allocation8 + $0xb0] sm:$0xff] }
 0x184   :  { %2057 = vmatprep.mubr.f32.mxu1 %v2532_v39  ;;  %913 = vmatpush1.msra.mxu1 %v535_v20  ;;  %v523_v39 = vld [vmem:[#allocation8 + $0xa8] sm:$0xff]  ;;  %v1216_v59 = vld [vmem:[#allocation11 + $0x30] sm:$0xff]  ;;  %v1214_v20 = vld [vmem:[#allocation11 + $0x20] sm:$0xff] }
 0x185   :  { %914 = vmatprep.subr.mxu1 %v533_v21  ;;  %1261 = vmatpush1.msra.mxu0 %v1252_v0  ;;  %v1218_v21 = vld [vmem:[#allocation11 + $0x40] sm:$0xff]  ;;  %v1213_v0 = vld [vmem:[#allocation11 + $0x18] sm:$0xff] }
 0x186   :  { %915 = vmatpush1.msra.mxu1 %v532_v27  ;;  %1262 = vmatprep.subr.mxu0 %v1250_v34  ;;  %v1215_v27 = vld [vmem:[#allocation11 + $0x28] sm:$0xff]  ;;  %v1210_v34 = vld [vmem:[#allocation11] sm:$0xff] }
 0x187   :  { %2058 = vmatmul.mubr.f32.gmra.mxu1 %v2529_v36  ;;  %916 = vmatprep.subr.mxu1 %v530_v24  ;;  %v518_v36 = vld [vmem:[#allocation8 + $0x80] sm:$0xff]  ;;  %v2195_v24 = vld [vmem:[#allocation6 + $0x38] sm:$0xff] }
 0x188   :  { %2060 = vmatprep.mubr.f32.mxu1 %v2538_v45  ;;  %917 = vmatpush1.msra.mxu1 %v529_v33  ;;  %v517_v45 = vld [vmem:[#allocation8 + $0x78] sm:$0xff]  ;;  %v2196_v33 = vld [vmem:[#allocation6 + $0x40] sm:$0xff] }
 0x189   :  { %918 = vmatprep.subr.mxu1 %v527_v38  ;;  %1263 = vmatpush1.msra.mxu0 %v1249_v40  ;;  %v2197_v38 = vld [vmem:[#allocation6 + $0x48] sm:$0xff]  ;;  %v2198_v40 = vld [vmem:[#allocation6 + $0x50] sm:$0xff] }
 0x18a   :  { %919 = vmatpush1.msra.mxu1 %v526_v44  ;;  %1264 = vmatprep.subr.mxu0 %v1247_v46  ;;  %v2199_v44 = vld [vmem:[#allocation6 + $0x58] sm:$0xff]  ;;  %v2200_v46 = vld [vmem:[#allocation6 + $0x60] sm:$0xff] }
 0x18b   :  { %2061 = vmatmul.mubr.f32.gmra.mxu1 %v2535_v42  ;;  %920 = vmatprep.subr.mxu1 %v524_v30  ;;  %v512_v42 = vld [vmem:[#allocation8 + $0x50] sm:$0xff]  ;;  %v2201_v30 = vld [vmem:[#allocation6 + $0x68] sm:$0xff] }
 0x18c   :  { %2063 = vmatprep.mubr.f32.mxu1 %v2544_v51  ;;  %921 = vmatpush1.msra.mxu1 %v523_v39  ;;  %v511_v51 = vld [vmem:[#allocation8 + $0x48] sm:$0xff]  ;;  %v2202_v39 = vld [vmem:[#allocation6 + $0x70] sm:$0xff] }
 0x18d   :  { %922 = vmatprep.subr.mxu1 %v521_v50  ;;  %1265 = vmatpush1.msra.mxu0 %v1246_v52  ;;  %v2203_v50 = vld [vmem:[#allocation6 + $0x78] sm:$0xff] }
 0x18e   :  { %923 = vmatpush1.msra.mxu1 %v520_v56  ;;  %1266 = vmatprep.subr.mxu0 %v1244_v58 }
 0x18f   :  { %2064 = vmatmul.mubr.f32.gmra.mxu1 %v2541_v48  ;;  %924 = vmatprep.subr.mxu1 %v518_v36  ;;  %v506_v48 = vld [vmem:[#allocation8 + $0x20] sm:$0xff] }
 0x190   :  { %2066 = vmatprep.mubr.f32.mxu1 %v2550_v57  ;;  %925 = vmatpush1.msra.mxu1 %v517_v45  ;;  %v505_v57 = vld [vmem:[#allocation8 + $0x18] sm:$0xff] }
 0x191   :  { %926 = vmatprep.subr.mxu1 %v515_v62  ;;  %1267 = vmatpush1.msra.mxu0 %v1243_v63 }
 0x192   :  { %927 = vmatpush1.msra.mxu1 %v514_v18  ;;  %1268 = vmatprep.subr.mxu0 %v1241_v22 }
 0x193   :  { %2067 = vmatmul.mubr.f32.gmra.mxu1 %v2547_v54  ;;  %928 = vmatprep.subr.mxu1 %v512_v42  ;;  %v1257_v54 = vld [vmem:[#allocation11 + $0x178] sm:$0xff] }
 0x194   :  { %2069 = vmatprep.mubr.f32.mxu1 %v2557_v61  ;;  %929 = vmatpush1.msra.mxu1 %v511_v51  ;;  %v1254_v61 = vld [vmem:[#allocation11 + $0x160] sm:$0xff] }
 0x195   :  { %930 = vmatprep.subr.mxu1 %v509_v26  ;;  %1269 = vmatpush1.msra.mxu0 %v1240_v28 }
 0x196   :  { %931 = vmatpush1.msra.mxu1 %v508_v32  ;;  %1270 = vmatprep.subr.mxu0 %v1238_v17 }
 0x197   :  { %2070 = vmatmul.mubr.f32.gmra.mxu1 %v2553_v60  ;;  %932 = vmatprep.subr.mxu1 %v506_v48  ;;  %v1251_v60 = vld [vmem:[#allocation11 + $0x148] sm:$0xff] }
 0x198   :  { %933 = vmatpush1.msra.mxu1 %v505_v57  ;;  %968 = vmatprep.mubr.f32.mxu1 %v2341_v4 }
 0x199   :  { %934 = vmatprep.subr.mxu1 %v503_v19  ;;  %1271 = vmatpush1.msra.mxu0 %v1237_v23 }
 0x19a   :  { %935 = vmatpush1.msra.mxu1 %v502_v25  ;;  %1272 = vmatprep.subr.mxu0 %v1235_v29 }
 0x19b   :  { %969 = vmatmul.mubr.f32.vlgmr.msra.gmra.mxu1 %v2460_v16  ;;  %2128 = vmatprep.subr.mxu1 %v1257_v54  ;;  %v1245_v16 = vld [vmem:[#allocation11 + $0x118] sm:$0xff] }
 0x19c   :  { %974 = vmatprep.mubr.f32.mxu1 %v2341_v4  ;;  %2129 = vmatpush3.msra.mxu1 %v1257_v54 }
 0x19d   :  { %2130 = vmatprep.subr.mxu1 %v1254_v61  ;;  %1273 = vmatpush1.msra.mxu0 %v1234_v31 }
 0x19e   :  { %2131 = vmatpush3.msra.mxu1 %v1254_v61  ;;  %1274 = vmatprep.subr.mxu0 %v1232_v35 }
 0x19f   :  { %975 = vmatmul.mubr.f32.gmra.mxu1 %v2456_v15  ;;  %2132 = vmatprep.subr.mxu1 %v1251_v60  ;;  %v1239_v15 = vld [vmem:[#allocation11 + $0xe8] sm:$0xff] }
 0x1a0   :  { %980 = vmatprep.mubr.f32.mxu1 %v2341_v4  ;;  %2133 = vmatpush3.msra.mxu1 %v1251_v60 }
 0x1a1   :  { %2134 = vmatprep.subr.mxu1 %v1248_v37  ;;  %1275 = vmatpush1.msra.mxu0 %v1231_v41 }
 0x1a2   :  { %2135 = vmatpush3.msra.mxu1 %v1248_v37  ;;  %1276 = vmatprep.subr.mxu0 %v1229_v8 }
 0x1a3   :  { %981 = vmatmul.mubr.f32.gmra.mxu1 %v2452_v14  ;;  %2136 = vmatprep.subr.mxu1 %v1245_v16  ;;  %v1233_v14 = vld [vmem:[#allocation11 + $0xb8] sm:$0xff] }
 0x1a4   :  { %986 = vmatprep.mubr.f32.mxu1 %v2341_v4  ;;  %2137 = vmatpush3.msra.mxu1 %v1245_v16 }
 0x1a5   :  { %2138 = vmatprep.subr.mxu1 %v1242_v9  ;;  %1277 = vmatpush1.msra.mxu0 %v1228_v6 }
 0x1a6   :  { %2139 = vmatpush3.msra.mxu1 %v1242_v9  ;;  %1278 = vmatprep.subr.mxu0 %v1226_v7 }
 0x1a7   :  { %987 = vmatmul.mubr.f32.gmra.mxu1 %v2448_v13  ;;  %2140 = vmatprep.subr.mxu1 %v1239_v15  ;;  %v1227_v13 = vld [vmem:[#allocation11 + $0x88] sm:$0xff] }
 0x1a8   :  { %992 = vmatprep.mubr.f32.mxu1 %v2341_v4  ;;  %2141 = vmatpush3.msra.mxu1 %v1239_v15 }
 0x1a9   :  { %2142 = vmatprep.subr.mxu1 %v1236_v43  ;;  %1279 = vmatpush1.msra.mxu0 %v1225_v5 }
 0x1aa   :  { %2143 = vmatpush3.msra.mxu1 %v1236_v43  ;;  %1280 = vmatprep.subr.mxu0 %v1223_v3 }
 0x1ab   :  { %993 = vmatmul.mubr.f32.gmra.mxu1 %v2444_v12  ;;  %2144 = vmatprep.subr.mxu1 %v1233_v14  ;;  %v1221_v12 = vld [vmem:[#allocation11 + $0x58] sm:$0xff] }
 0x1ac   :  { %998 = vmatprep.mubr.f32.mxu1 %v2341_v4  ;;  %2145 = vmatpush3.msra.mxu1 %v1233_v14 }
 0x1ad   :  { %2146 = vmatprep.subr.mxu1 %v1230_v47  ;;  %1281 = vmatpush1.msra.mxu0 %v1222_v49 }
 0x1ae   :  { %2147 = vmatpush3.msra.mxu1 %v1230_v47  ;;  %1282 = vmatprep.subr.mxu0 %v1220_v53 }
 0x1af   :  { %999 = vmatmul.mubr.f32.gmra.mxu1 %v2440_v11  ;;  %2148 = vmatprep.subr.mxu1 %v1227_v13  ;;  %v1211_v11 = vld [vmem:[#allocation11 + $0x8] sm:$0xff] }
 0x1b0   :  { %1004 = vmatprep.mubr.f32.mxu1 %v2341_v4  ;;  %2149 = vmatpush3.msra.mxu1 %v1227_v13 }
 0x1b1   :  { %2150 = vmatprep.subr.mxu1 %v1224_v2  ;;  %1283 = vmatpush1.msra.mxu0 %v1219_v1 }
 0x1b2   :  { %2151 = vmatpush3.msra.mxu1 %v1224_v2  ;;  %1284 = vmatprep.subr.mxu0 %v1217_v55 }
 0x1b3   :  { %1005 = vmatmul.mubr.f32.gmra.mxu1 %v2436_v10  ;;  %2152 = vmatprep.subr.mxu1 %v1221_v12  ;;  %v1212_v10 = vld [vmem:[#allocation11 + $0x10] sm:$0xff] }
 0x1b4   :  { %1010 = vmatprep.mubr.f32.mxu1 %v2341_v4  ;;  %1285 = vmatpush1.msra.mxu0 %v1216_v59 }
 0x1b5   :  { %2153 = vmatpush3.msra.mxu1 %v1221_v12  ;;  %1286 = vmatprep.subr.mxu0 %v1214_v20 }
 0x1b6   :  { %2154 = vmatprep.subr.mxu1 %v1218_v21  ;;  %1287 = vmatpush1.msra.mxu0 %v1213_v0 }
 0x1b7   :  { %1011 = vmatmul.mubr.f32.gmra.mxu1 %v2195_v24  ;;  %1288 = vmatprep.subr.mxu0 %v1211_v11 }
 0x1b8   :  { %1016 = vmatprep.mubr.f32.mxu1 %v2341_v4  ;;  %2155 = vmatpush3.msra.mxu1 %v1218_v21 }
 0x1b9   :  { %2156 = vmatprep.subr.mxu1 %v1215_v27  ;;  %1289 = vmatpush1.msra.mxu0 %v1210_v34 }
 0x1ba   :  { %2157 = vmatpush3.msra.mxu1 %v1215_v27  ;;  %1322 = vmatprep.mubr.f32.mxu0 %v2341_v4 }
 0x1bb   :  { %1017 = vmatmul.mubr.f32.gmra.mxu1 %v2196_v33  ;;  %2158 = vmatprep.subr.mxu1 %v1212_v10 }
 0x1bc   :  { %1022 = vmatprep.mubr.f32.mxu1 %v2341_v4  ;;  %2159 = vmatpush3.msra.mxu1 %v1212_v10 }
 0x1bf   :  { %1023 = vmatmul.mubr.f32.gmra.mxu1 %v2197_v38 }
 0x1c0   :  { %1028 = vmatprep.mubr.f32.mxu1 %v2341_v4 }
 0x1c3   :  { %1029 = vmatmul.mubr.f32.gmra.mxu1 %v2198_v40 }
 0x1c4   :  { %1034 = vmatprep.mubr.f32.mxu1 %v2341_v4 }
 0x1c7   :  { %1035 = vmatmul.mubr.f32.gmra.mxu1 %v2199_v44 }
 0x1c8   :  { %1040 = vmatprep.mubr.f32.mxu1 %v2341_v4 }
 0x1cb   :  { %1041 = vmatmul.mubr.f32.gmra.mxu1 %v2200_v46 }
 0x1cc   :  { %1046 = vmatprep.mubr.f32.mxu1 %v2341_v4 }
 0x1cf   :  { %1047 = vmatmul.mubr.f32.gmra.mxu1 %v2201_v30 }
 0x1d0   :  { %1052 = vmatprep.mubr.f32.mxu1 %v2341_v4 }
 0x1d3   :  { %1053 = vmatmul.mubr.f32.gmra.mxu1 %v2202_v39 }
 0x1d4   :  { %1058 = vmatprep.mubr.f32.mxu1 %v2341_v4 }
 0x1d7   :  { %1059 = vmatmul.mubr.f32.gmra.mxu1 %v2203_v50 }
 0x1e1   :  { %v2679_v45 = vpop.f32.mrf.mxu0 }
 0x1e3   :  { %v2682_v18 = vpop.f32.mrf.mxu0 }
 0x1e5   :  { %v2685_v51 = vpop.f32.mrf.mxu0 }
 0x1e7   :  { %v2688_v32 = vpop.f32.mrf.mxu0 }
 0x1e9   :  { %v2691_v57 = vpop.f32.mrf.mxu0 }
 0x1eb   :  { %v2694_v25 = vpop.f32.mrf.mxu0 }
 0x1ed   :  { %v2697_v61 = vpop.f32.mrf.mxu0 }
 0x1ef   :  { %v2704_v60 = vpop.f32.mrf.mxu0 }
 0x1f1   :  { %v2711_v8 = vpop.f32.mrf.mxu0 }
 0x1f3   :  { %v2718_v6 = vpop.f32.mrf.mxu0 }
 0x1f5   :  { %v2725_v43 = vpop.f32.mrf.mxu0 }
 0x1f7   :  { %v2732_v14 = vpop.f32.mrf.mxu0 }
 0x1f9   :  { %v2739_v53 = vpop.f32.mrf.mxu0 }
 0x1fa   :  { %3039 = vst [vmem:[#allocation17_spill] sm:$0xff] %v2739_v53 }
 0x1fb   :  { %v2746_v1 = vpop.f32.mrf.mxu0 }
 0x1fc   :  { %3042 = vst [vmem:[#allocation20_spill] sm:$0xff] %v2746_v1 }
 0x1fd   :  { %v2751_v12 = vpop.f32.mrf.mxu0 }
 0x1fe   :  { %3044 = vst [vmem:[#allocation22_spill] sm:$0xff] %v2751_v12 }
 0x1ff   :  { %v2755_v20 = vpop.f32.mrf.mxu0 }
 0x200   :  { %3046 = vst [vmem:[#allocation24_spill] sm:$0xff] %v2755_v20 }
 0x201   :  { %v2759_v0 = vpop.f32.mrf.mxu0 }
 0x202   :  { %3047 = vst [vmem:[#allocation25_spill] sm:$0xff] %v2759_v0 }
 0x203   :  { %v2763_v27 = vpop.f32.mrf.mxu0 }
 0x204   :  { %3048 = vst [vmem:[#allocation26_spill] sm:$0xff] %v2763_v27 }
 0x21b   :  { %v1994_v52 = vpop.f32.mrf.mxu1 }
 0x21d   :  { %v423_v56 = vpop.f32.mrf.mxu1 }
 0x21e   :  { %1323 = vmatmul.mubr.f32.vlgmr.msra.gmra.mxu0 %v423_v56  ;;  %2160 = vmatprep.mubr.f32.mxu1 %v423_v56 }
 0x21f   :  { %v1997_v58 = vpop.f32.mrf.mxu1  ;;  %2161 = vmatmul.mubr.f32.vlgmr.msra.gmra.mxu1 %v1994_v52  ;;  %1328 = vmatprep.mubr.f32.mxu0 %v2341_v4 }
 0x221   :  { %v433_v36 = vpop.f32.mrf.mxu1 }
 0x222   :  { %1329 = vmatmul.mubr.f32.gmra.mxu0 %v1994_v52  ;;  %2163 = vmatprep.mubr.f32.mxu1 %v433_v36 }
 0x223   :  { %v2000_v62 = vpop.f32.mrf.mxu1  ;;  %2164 = vmatmul.mubr.f32.gmra.mxu1 %v1997_v58  ;;  %1334 = vmatprep.mubr.f32.mxu0 %v2341_v4 }
 0x225   :  { %v443_v63 = vpop.f32.mrf.mxu1 }
 0x226   :  { %1335 = vmatmul.mubr.f32.gmra.mxu0 %v433_v36  ;;  %2166 = vmatprep.mubr.f32.mxu1 %v443_v63 }
 0x227   :  { %v2003_v22 = vpop.f32.mrf.mxu1  ;;  %2167 = vmatmul.mubr.f32.gmra.mxu1 %v2000_v62  ;;  %1340 = vmatprep.mubr.f32.mxu0 %v2341_v4 }
 0x229   :  { %v453_v42 = vpop.f32.mrf.mxu1 }
 0x22a   :  { %1341 = vmatmul.mubr.f32.gmra.mxu0 %v1997_v58  ;;  %2169 = vmatprep.mubr.f32.mxu1 %v453_v42 }
 0x22b   :  { %v2006_v26 = vpop.f32.mrf.mxu1  ;;  %2170 = vmatmul.mubr.f32.gmra.mxu1 %v2003_v22  ;;  %1346 = vmatprep.mubr.f32.mxu0 %v2341_v4 }
 0x22d   :  { %v463_v28 = vpop.f32.mrf.mxu1 }
 0x22e   :  { %1347 = vmatmul.mubr.f32.gmra.mxu0 %v443_v63  ;;  %2172 = vmatprep.mubr.f32.mxu1 %v463_v28 }
 0x22f   :  { %v2009_v17 = vpop.f32.mrf.mxu1  ;;  %2173 = vmatmul.mubr.f32.gmra.mxu1 %v2006_v26  ;;  %1352 = vmatprep.mubr.f32.mxu0 %v2341_v4 }
 0x231   :  { %v473_v48 = vpop.f32.mrf.mxu1 }
 0x232   :  { %1353 = vmatmul.mubr.f32.gmra.mxu0 %v2000_v62  ;;  %2175 = vmatprep.mubr.f32.mxu1 %v473_v48 }
 0x233   :  { %v2012_v19 = vpop.f32.mrf.mxu1  ;;  %2176 = vmatmul.mubr.f32.gmra.mxu1 %v2009_v17  ;;  %1358 = vmatprep.mubr.f32.mxu0 %v2341_v4 }
 0x235   :  { %v483_v23 = vpop.f32.mrf.mxu1 }
 0x236   :  { %1359 = vmatmul.mubr.f32.gmra.mxu0 %v453_v42  ;;  %2178 = vmatprep.mubr.f32.mxu1 %v483_v23 }
 0x237   :  { %v2015_v29 = vpop.f32.mrf.mxu1  ;;  %2179 = vmatmul.mubr.f32.gmra.mxu1 %v2012_v19  ;;  %1364 = vmatprep.mubr.f32.mxu0 %v2341_v4 }
 0x239   :  { %v493_v54 = vpop.f32.mrf.mxu1 }
 0x23a   :  { %1365 = vmatmul.mubr.f32.gmra.mxu0 %v2003_v22  ;;  %2181 = vmatprep.mubr.f32.mxu1 %v493_v54 }
 0x23b   :  { %v2699_v31 = vpop.f32.mrf.mxu1  ;;  %2182 = vmatmul.mubr.f32.gmra.mxu1 %v2015_v29  ;;  %1370 = vmatprep.mubr.f32.mxu0 %v2341_v4 }
 0x23d   :  { %v2702_v35 = vpop.f32.mrf.mxu1 }
 0x23e   :  { %1371 = vmatmul.mubr.f32.gmra.mxu0 %v463_v28 }
 0x23f   :  { %v2706_v37 = vpop.f32.mrf.mxu1  ;;  %1376 = vmatprep.mubr.f32.mxu0 %v2341_v4 }
 0x241   :  { %v2709_v41 = vpop.f32.mrf.mxu1 }
 0x242   :  { %1377 = vmatmul.mubr.f32.gmra.mxu0 %v2006_v26 }
 0x243   :  { %v2713_v16 = vpop.f32.mrf.mxu1  ;;  %1382 = vmatprep.mubr.f32.mxu0 %v2341_v4 }
 0x245   :  { %v2716_v9 = vpop.f32.mrf.mxu1 }
 0x246   :  { %1383 = vmatmul.mubr.f32.gmra.mxu0 %v473_v48 }
 0x247   :  { %v2720_v7 = vpop.f32.mrf.mxu1  ;;  %1388 = vmatprep.mubr.f32.mxu0 %v2341_v4 }
 0x249   :  { %v2723_v15 = vpop.f32.mrf.mxu1 }
 0x24a   :  { %1389 = vmatmul.mubr.f32.gmra.mxu0 %v2009_v17 }
 0x24b   :  { %v2727_v5 = vpop.f32.mrf.mxu1  ;;  %1394 = vmatprep.mubr.f32.mxu0 %v2341_v4 }
 0x24d   :  { %v2730_v3 = vpop.f32.mrf.mxu1 }
 0x24e   :  { %1395 = vmatmul.mubr.f32.gmra.mxu0 %v483_v23 }
 0x24f   :  { %v2734_v47 = vpop.f32.mrf.mxu1  ;;  %1400 = vmatprep.mubr.f32.mxu0 %v2341_v4 }
 0x251   :  { %v2737_v49 = vpop.f32.mrf.mxu1 }
 0x252   :  { %1401 = vmatmul.mubr.f32.gmra.mxu0 %v2012_v19 }
 0x253   :  { %v2741_v13 = vpop.f32.mrf.mxu1  ;;  %1406 = vmatprep.mubr.f32.mxu0 %v2341_v4 }
 0x254   :  { %3040 = vst [vmem:[#allocation18_spill] sm:$0xff] %v2741_v13 }
 0x255   :  { %v2744_v2 = vpop.f32.mrf.mxu1 }
 0x256   :  { %3041 = vst [vmem:[#allocation19_spill] sm:$0xff] %v2744_v2  ;;  %1407 = vmatmul.mubr.f32.gmra.mxu0 %v493_v54 }
 0x257   :  { %1412 = vmatprep.mubr.f32.mxu0 %v2341_v4  ;;  %v2749_v55 = vpop.f32.mrf.mxu1  ;;  %v2767_v4 = vpop.f32.mrf.mxu0 }
 0x258   :  { %3043 = vst [vmem:[#allocation21_spill] sm:$0xff] %v2749_v55  ;;  %3049 = vst [vmem:[#allocation27_spill] sm:$0xff] %v2767_v4 }
 0x259   :  { %v2753_v59 = vpop.f32.mrf.mxu1  ;;  %v2771_v10 = vpop.f32.mrf.mxu0 }
 0x25a   :  { %1413 = vmatmul.mubr.f32.gmra.mxu0 %v2015_v29  ;;  %3045 = vst [vmem:[#allocation23_spill] sm:$0xff] %v2753_v59  ;;  %3050 = vst [vmem:[#allocation28_spill] sm:$0xff] %v2771_v10 }
 0x25b   :  { %v2757_v21 = vpop.f32.mrf.mxu1  ;;  %v2775_v38 = vpop.f32.mrf.mxu0 }
 0x25c   :  { %3051 = vst [vmem:[#allocation29_spill] sm:$0xff] %v2775_v38 }
 0x25d   :  { %v2761_v11 = vpop.f32.mrf.mxu1  ;;  %v2779_v44 = vpop.f32.mrf.mxu0 }
 0x25e   :  { %3052 = vst [vmem:[#allocation30_spill] sm:$0xff] %v2779_v44 }
 0x25f   :  { %v2765_v34 = vpop.f32.mrf.mxu1  ;;  %v2783_v30 = vpop.f32.mrf.mxu0 }
 0x260   :  { %3053 = vst [vmem:[#allocation31_spill] sm:$0xff] %v2783_v30 }
 0x261   :  { %v2769_v24 = vpop.f32.mrf.mxu1  ;;  %v2787_v50 = vpop.f32.mrf.mxu0 }
 0x262   :  { %3054 = vst [vmem:[#allocation32_spill] sm:$0xff] %v2787_v50 }
 0x263   :  { %v2773_v33 = vpop.f32.mrf.mxu1  ;;  %v2791_v56 = vpop.f32.mrf.mxu0 }
 0x264   :  { %3055 = vst [vmem:[#allocation33_spill] sm:$0xff] %v2791_v56 }
 0x265   :  { %v2777_v40 = vpop.f32.mrf.mxu1  ;;  %v2795_v36 = vpop.f32.mrf.mxu0 }
 0x266   :  { %3056 = vst [vmem:[#allocation34_spill] sm:$0xff] %v2795_v36 }
 0x267   :  { %v2781_v46 = vpop.f32.mrf.mxu1  ;;  %v2799_v63 = vpop.f32.mrf.mxu0 }
 0x268   :  { %3057 = vst [vmem:[#allocation35_spill] sm:$0xff] %v2799_v63 }
 0x269   :  { %v2785_v39 = vpop.f32.mrf.mxu1  ;;  %v2803_v42 = vpop.f32.mrf.mxu0 }
 0x26a   :  { %3058 = vst [vmem:[#allocation36_spill] sm:$0xff] %v2803_v42 }
 0x26b   :  { %v2789_v52 = vpop.f32.mrf.mxu1  ;;  %v2807_v28 = vpop.f32.mrf.mxu0 }
 0x26c   :  { %3060 = vst [vmem:[#allocation38_spill] sm:$0xff] %v2807_v28 }
 0x26d   :  { %v2793_v58 = vpop.f32.mrf.mxu1  ;;  %v2811_v48 = vpop.f32.mrf.mxu0 }
 0x26e   :  { %3062 = vst [vmem:[#allocation40_spill] sm:$0xff] %v2811_v48 }
 0x26f   :  { %v2797_v62 = vpop.f32.mrf.mxu1  ;;  %v2815_v23 = vpop.f32.mrf.mxu0 }
 0x270   :  { %3064 = vst [vmem:[#allocation42_spill] sm:$0xff] %v2815_v23 }
 0x271   :  { %v2801_v22 = vpop.f32.mrf.mxu1  ;;  %v2819_v54 = vpop.f32.mrf.mxu0 }
 0x272   :  { %3066 = vst [vmem:[#allocation44_spill] sm:$0xff] %v2819_v54 }
 0x273   :  { %v2805_v26 = vpop.f32.mrf.mxu1  ;;  %v2106_v63 = vpop.f32.mrf.mxu0 }
 0x274   :  { %3059 = vst [vmem:[#allocation37_spill] sm:$0xff] %v2805_v26 }
 0x275   :  { %v2809_v17 = vpop.f32.mrf.mxu1  ;;  %v1131_v42 = vpop.f32.mrf.mxu0 }
 0x276   :  { %3061 = vst [vmem:[#allocation39_spill] sm:$0xff] %v2809_v17 }
 0x277   :  { %v2813_v19 = vpop.f32.mrf.mxu1  ;;  %v2109_v50 = vpop.f32.mrf.mxu0 }
 0x278   :  { %3063 = vst [vmem:[#allocation41_spill] sm:$0xff] %v2813_v19 }
 0x279   :  { %v2817_v29 = vpop.f32.mrf.mxu1  ;;  %v1141_v30 = vpop.f32.mrf.mxu0 }
 0x27a   :  { %3065 = vst [vmem:[#allocation43_spill] sm:$0xff] %v2817_v29 }
 0x27b   :  { %v2821_v36 = vpop.f32.mrf.mxu1  ;;  %v2829_v48 = vpop.f32.mrf.mxu0 }
 0x27c   :  { %3067 = vst [vmem:[#allocation45_spill] sm:$0xff] %v2821_v36 }
 0x27d   :  { %v2823_v56 = vpop.f32.mrf.mxu1  ;;  %v2833_v23 = vpop.f32.mrf.mxu0 }
 0x27e   :  { %3068 = vst [vmem:[#allocation46_spill] sm:$0xff] %v2823_v56 }
 0x27f   :  { %v2825_v28 = vpop.f32.mrf.mxu1  ;;  %v2837_v54 = vpop.f32.mrf.mxu0 }
 0x280   :  { %3069 = vst [vmem:[#allocation47_spill] sm:$0xff] %v2825_v28 }
 0x281   :  { %v2827_v44 = vpop.f32.mrf.mxu1  ;;  %v2841_v27 = vpop.f32.mrf.mxu0 }
 0x282   :  { %3070 = vst [vmem:[#allocation48_spill] sm:$0xff] %v2827_v44 }
 0x283   :  { %v2831_v38 = vpop.f32.mrf.mxu1  ;;  %v2845_v28 = vpop.f32.mrf.mxu0 }
 0x284   :  { %3071 = vst [vmem:[#allocation49_spill] sm:$0xff] %v2831_v38 }
 0x285   :  { %v2835_v10 = vpop.f32.mrf.mxu1  ;;  %v2849_v44 = vpop.f32.mrf.mxu0 }
 0x286   :  { %3072 = vst [vmem:[#allocation50_spill] sm:$0xff] %v2835_v10 }
 0x287   :  { %v2839_v4 = vpop.f32.mrf.mxu1  ;;  %v2853_v38 = vpop.f32.mrf.mxu0 }
 0x288   :  { %3073 = vst [vmem:[#allocation51_spill] sm:$0xff] %v2839_v4 }
 0x289   :  { %v2843_v56 = vpop.f32.mrf.mxu1  ;;  %v2857_v10 = vpop.f32.mrf.mxu0 }
 0x28a   :  { %3074 = vst [vmem:[#allocation52_spill] sm:$0xff] %v2843_v56  ;;  %v1614_v56 = vlaneseq }
 0x28b   :  { %v2847_v36 = vpop.f32.mrf.mxu1  ;;  %v2861_v4 = vpop.f32.mrf.mxu0 }
 0x28c   :  { %3075 = vst [vmem:[#allocation53_spill] sm:$0xff] %v2847_v36  ;;  %3079 = vst [vmem:[#allocation57_spill] sm:$0xff] %v2861_v4  ;;  %v1615_v19 = vshrl.u32 %v1614_v56, 7  ;;  %v1137_v56 = vadd.f32 %v2106_v63, %v2699_v31  ;;  %v973_v4 = vadd.f32 %v2761_v11, %v2682_v18 }
 0x28d   :  { %v2851_v0 = vpop.f32.mrf.mxu1  ;;  %v2865_v55 = vpop.f32.mrf.mxu0 }
 0x28e   :  { %3076 = vst [vmem:[#allocation54_spill] sm:$0xff] %v2851_v0  ;;  %3081 = vst [vmem:[#allocation59_spill] sm:$0xff] %v2865_v55  ;;  %v1616_v2 = vsub.s32 0, %v1615_v19  ;;  %v1620_v17 = vsub.s32 1, %v1615_v19 }
 0x28f   :  { %v2855_v59 = vpop.f32.mrf.mxu1  ;;  %v2869_v12 = vpop.f32.mrf.mxu0 }
 0x290   :  { %3077 = vst [vmem:[#allocation55_spill] sm:$0xff] %v2855_v59  ;;  %3083 = vst [vmem:[#allocation61_spill] sm:$0xff] %v2869_v12  ;;  %v1612_v59 = vld [vmem:[%s3037_s5] sm:$0x7]  ;;  %s2342_s5 = smov [#allocation12]  }
 0x291   :  { %v2859_v29 = vpop.f32.mrf.mxu1  ;;  %v2876_v1 = vpop.f32.mrf.mxu0  ;;  %s1730_s23 = sshll.u32 %s2342_s5, 4  ;;  %s1731_s23 = int_to_ptr.vmem [resolvable:$true] %s1730_s23 }
 0x292   :  { %3078 = vst [vmem:[#allocation56_spill] sm:$0xff] %v2859_v29  ;;  %v1624_v29 = vsub.s32 2, %v1615_v19  ;;  %3085 = vst [vmem:[#allocation63_spill] sm:$0xff] %v2876_v1  ;;  %v2889_v19 = vrot.slane %v1612_v59, %v1620_v17  ;;  %v1132_v1 = vadd.f32 %v1131_v42, %v2702_v35  ;;  %s2304_s24 = scalar_lea.vmem %s1731_s23, 6144  ;;  %p2309_p12 = scmp.lt.s32.totalorder %s1731_s23, %s1731_s23 }
 0x293   :  { %v2863_v20 = vpop.f32.mrf.mxu1  ;;  %p2305_p11 = scmp.ne.s32.totalorder %s1731_s23, %s2304_s24  ;;  %p2310_p13 = scmp.lt.s32.totalorder %s2304_s24, %s2304_s24 }
 0x294   :  { %3080 = vst [vmem:[#allocation58_spill] sm:$0xff] %v2863_v20  ;;  %v971_v20 = vadd.f32 %v2757_v21, %v2679_v45 }
 0x295   :  { %v2867_v36 = vpop.f32.mrf.mxu1  ;;  %p2311_p0 = por %p2310_p13, %p2309_p12 }
 0x296   :  { %3082 = vst [vmem:[#allocation60_spill] sm:$0xff] %v2867_v36  ;;  %v2882_v36 = vrot.slane %v1612_v59, %v1616_v2  ;;  %v977_v2 = vadd.f32 %v2765_v34, %v2685_v51  ;;  %v1142_v51 = vadd.f32 %v1141_v30, %v2709_v41  ;;  %v985_v30 = vadd.f32 %v2777_v40, %v2694_v25 }
 0x297   :  { %v2871_v0 = vpop.f32.mrf.mxu1  ;;  %p2312_p1 = pnand %p2311_p0, %p2305_p11 }
 0x298   :  { %3084 = vst [vmem:[#allocation62_spill] sm:$0xff] %v2871_v0  ;;  %v2885_v0 = vrot.slane %v1612_v59, %v1624_v29  ;;  %v1147_v29 = vadd.f32 %v2109_v50, %v2706_v37  ;;  %v979_v59 = vadd.f32 %v2769_v24, %v2688_v32  ;;  %v983_v37 = vadd.f32 %v2773_v33, %v2691_v57 }
 0x299   :  { %v2880_v55 = vpop.f32.mrf.mxu1  ;;  %v1157_v24 = vadd.f32 %v2829_v48, %v2713_v16 }
 0x29a   :  { %3086 = vst [vmem:[#allocation64_spill] sm:$0xff] %v2880_v55 }
 0x2de   :  { %v1324_v12 = vpop.f32.mrf.mxu0 }
 0x2df   :  { %v1564_v13 = vadd.f32 %v1324_v12, %v971_v20  ;;  %v2162_v26 = vpop.f32.mrf.mxu1 }
 0x2e0   :  { %v1569_v53 = vadd.f32 %v2162_v26, %v1137_v56  ;;  %v1326_v45 = vpop.f32.mrf.mxu0  ;;  %v1152_v26 = vadd.f32 %v2833_v23, %v2716_v9  ;;  %v989_v56 = vadd.f32 %v2781_v46, %v2697_v61 }
 0x2e1   :  { %v1629_v21 = vadd.f32 %v2882_v36, %v1564_v13  ;;  %v1565_v31 = vadd.f32 %v1326_v45, %v973_v4  ;;  %v1485_v63 = vpop.f32.mrf.mxu1 }
 0x2e2   :  { %v1634_v55 = vadd.f32 %v2885_v0, %v1569_v53  ;;  %v1566_v18 = vadd.f32 %v1485_v63, %v1132_v1  ;;  %v1330_v12 = vpop.f32.mrf.mxu0 }
 0x2e3   :  { %1677 = vst [vmem:[#allocation12] sm:$0xff] %v1629_v21  ;;  %v1630_v35 = vadd.f32 %v2889_v19, %v1565_v31  ;;  %v1567_v20 = vadd.f32 %v1330_v12, %v977_v2  ;;  %v2165_v11 = vpop.f32.mrf.mxu1  ;;  %v1167_v2 = vadd.f32 %v2837_v54, %v2720_v7  ;;  %v991_v31 = vadd.f32 %v2785_v39, %v2704_v60 }
 0x2e4   :  { %1682 = vst [vmem:[#allocation12 + $0x28] sm:$0xff] %v1634_v55  ;;  %v1631_v13 = vadd.f32 %v2885_v0, %v1566_v18  ;;  %v1575_v34 = vadd.f32 %v2165_v11, %v1147_v29  ;;  %v1332_v4 = vpop.f32.mrf.mxu0  ;;  %v1162_v29 = vadd.f32 %v2841_v27, %v2723_v15  ;;  %v995_v12 = vadd.f32 %v2789_v52, %v2711_v8 }
 0x2e5   :  { %1678 = vst [vmem:[#allocation12 + $0x8] sm:$0xff] %v1630_v35  ;;  %v1632_v53 = vadd.f32 %v2882_v36, %v1567_v20  ;;  %v1568_v1 = vadd.f32 %v1332_v4, %v979_v59  ;;  %v1495_v32 = vpop.f32.mrf.mxu1  ;;  %v1177_v35 = vadd.f32 %v2845_v28, %v2727_v5  ;;  %v997_v11 = vadd.f32 %v2793_v58, %v2718_v6 }
 0x2e6   :  { %1679 = vst [vmem:[#allocation12 + $0x10] sm:$0xff] %v1631_v13  ;;  %v1640_v50 = vadd.f32 %v2885_v0, %v1575_v34  ;;  %v1572_v41 = vadd.f32 %v1495_v32, %v1142_v51  ;;  %v1336_v55 = vpop.f32.mrf.mxu0  ;;  %v1172_v13 = vadd.f32 %v2849_v44, %v2730_v3  ;;  %v1001_v4 = vadd.f32 %v2797_v62, %v2725_v43 }
 0x2e7   :  { %1680 = vst [vmem:[#allocation12 + $0x18] sm:$0xff] %v1632_v53  ;;  %v1633_v42 = vadd.f32 %v2889_v19, %v1568_v1  ;;  %v1570_v57 = vadd.f32 %v1336_v55, %v983_v37  ;;  %v2168_v33 = vpop.f32.mrf.mxu1  ;;  %v1187_v53 = vadd.f32 %v2853_v38, %v2734_v47  ;;  %v1003_v32 = vadd.f32 %v2801_v22, %v2732_v14  ;;  %v3087_v55 = vld [vmem:[#allocation17_spill] sm:$0xff] }
 0x2e8   :  { %1688 = vst [vmem:[#allocation12 + $0x58] sm:$0xff] %v1640_v50  ;;  %v1637_v17 = vadd.f32 %v2885_v0, %v1572_v41  ;;  %v1581_v16 = vadd.f32 %v2168_v33, %v1157_v24  ;;  %v1338_v48 = vpop.f32.mrf.mxu0  ;;  %v1182_v50 = vadd.f32 %v2857_v10, %v2737_v49  ;;  %v3089_v33 = vld [vmem:[#allocation18_spill] sm:$0xff] }
 0x2e9   :  { %1681 = vst [vmem:[#allocation12 + $0x20] sm:$0xff] %v1633_v42  ;;  %v1635_v45 = vadd.f32 %v2882_v36, %v1570_v57  ;;  %v1571_v25 = vadd.f32 %v1338_v48, %v985_v30  ;;  %v1505_v40 = vpop.f32.mrf.mxu1  ;;  %v3088_v30 = vld [vmem:[#allocation37_spill] sm:$0xff]  ;;  %v3091_v48 = vld [vmem:[#allocation20_spill] sm:$0xff] }
 0x2ea   :  { %1685 = vst [vmem:[#allocation12 + $0x40] sm:$0xff] %v1637_v17  ;;  %v1646_v21 = vadd.f32 %v2885_v0, %v1581_v16  ;;  %v1578_v9 = vadd.f32 %v1505_v40, %v1152_v26  ;;  %v1342_v23 = vpop.f32.mrf.mxu0  ;;  %v1007_v42 = vadd.f32 %v3088_v30, %v3087_v55  ;;  %v3090_v26 = vld [vmem:[#allocation57_spill] sm:$0xff] }
 0x2eb   :  { %1683 = vst [vmem:[#allocation12 + $0x30] sm:$0xff] %v1635_v45  ;;  %v1636_v63 = vadd.f32 %v2889_v19, %v1571_v25  ;;  %v1573_v61 = vadd.f32 %v1342_v23, %v989_v56  ;;  %v2171_v46 = vpop.f32.mrf.mxu1  ;;  %v1197_v17 = vadd.f32 %v3090_v26, %v3089_v33  ;;  %v3092_v56 = vld [vmem:[#allocation39_spill] sm:$0xff] }
 0x2ec   :  { %1694 = vst [vmem:[#allocation12 + $0x88] sm:$0xff] %v1646_v21  ;;  %v1643_v18 = vadd.f32 %v2885_v0, %v1578_v9  ;;  %v1587_v7 = vadd.f32 %v2171_v46, %v1167_v2  ;;  %v1344_v54 = vpop.f32.mrf.mxu0  ;;  %v1009_v45 = vadd.f32 %v3092_v56, %v3091_v48  ;;  %v3093_v21 = vld [vmem:[#allocation19_spill] sm:$0xff]  ;;  %v3095_v46 = vld [vmem:[#allocation22_spill] sm:$0xff] }
 0x2ed   :  { %1684 = vst [vmem:[#allocation12 + $0x38] sm:$0xff] %v1636_v63  ;;  %v1638_v59 = vadd.f32 %v2882_v36, %v1573_v61  ;;  %v1574_v60 = vadd.f32 %v1344_v54, %v991_v31  ;;  %v1515_v39 = vpop.f32.mrf.mxu1  ;;  %v3094_v9 = vld [vmem:[#allocation59_spill] sm:$0xff] }
 0x2ee   :  { %1691 = vst [vmem:[#allocation12 + $0x70] sm:$0xff] %v1643_v18  ;;  %v1652_v20 = vadd.f32 %v2885_v0, %v1587_v7  ;;  %v1584_v15 = vadd.f32 %v1515_v39, %v1162_v29  ;;  %v1348_v27 = vpop.f32.mrf.mxu0  ;;  %v1192_v23 = vadd.f32 %v3094_v9, %v3093_v21  ;;  %v3096_v29 = vld [vmem:[#allocation41_spill] sm:$0xff] }
 0x2ef   :  { %1686 = vst [vmem:[#allocation12 + $0x48] sm:$0xff] %v1638_v59  ;;  %v1639_v51 = vadd.f32 %v2889_v19, %v1574_v60  ;;  %v1576_v8 = vadd.f32 %v1348_v27, %v995_v12  ;;  %v2174_v52 = vpop.f32.mrf.mxu1  ;;  %v1013_v18 = vadd.f32 %v3096_v29, %v3095_v46  ;;  %v3097_v59 = vld [vmem:[#allocation21_spill] sm:$0xff]  ;;  %v3099_v27 = vld [vmem:[#allocation24_spill] sm:$0xff] }
 0x2f0   :  { %1700 = vst [vmem:[#allocation12 + $0xb8] sm:$0xff] %v1652_v20  ;;  %v1649_v34 = vadd.f32 %v2885_v0, %v1584_v15  ;;  %v1593_v5 = vadd.f32 %v2174_v52, %v1177_v35  ;;  %v1350_v28 = vpop.f32.mrf.mxu0  ;;  %v3098_v60 = vld [vmem:[#allocation61_spill] sm:$0xff] }
 0x2f1   :  { %1687 = vst [vmem:[#allocation12 + $0x50] sm:$0xff] %v1639_v51  ;;  %v1641_v37 = vadd.f32 %v2882_v36, %v1576_v8  ;;  %v1577_v6 = vadd.f32 %v1350_v28, %v997_v11  ;;  %v1525_v58 = vpop.f32.mrf.mxu1  ;;  %v1207_v39 = vadd.f32 %v3098_v60, %v3097_v59  ;;  %v3100_v11 = vld [vmem:[#allocation43_spill] sm:$0xff] }
 0x2f2   :  { %1697 = vst [vmem:[#allocation12 + $0xa0] sm:$0xff] %v1649_v34  ;;  %v1658_v1 = vadd.f32 %v2885_v0, %v1593_v5  ;;  %v1590_v3 = vadd.f32 %v1525_v58, %v1172_v13  ;;  %v1354_v44 = vpop.f32.mrf.mxu0  ;;  %v1015_v51 = vadd.f32 %v3100_v11, %v3099_v27  ;;  %v3101_v34 = vld [vmem:[#allocation23_spill] sm:$0xff]  ;;  %v3103_v58 = vld [vmem:[#allocation25_spill] sm:$0xff] }
 0x2f3   :  { %1689 = vst [vmem:[#allocation12 + $0x60] sm:$0xff] %v1641_v37  ;;  %v1642_v24 = vadd.f32 %v2889_v19, %v1577_v6  ;;  %v1579_v43 = vadd.f32 %v1354_v44, %v1001_v4  ;;  %v2177_v62 = vpop.f32.mrf.mxu1  ;;  %v3102_v5 = vld [vmem:[#allocation63_spill] sm:$0xff] }
 0x2f4   :  { %1706 = vst [vmem:[#allocation12 + $0xe8] sm:$0xff] %v1658_v1  ;;  %v1655_v41 = vadd.f32 %v2885_v0, %v1590_v3  ;;  %v1599_v47 = vadd.f32 %v2177_v62, %v1187_v53  ;;  %v1356_v38 = vpop.f32.mrf.mxu0  ;;  %v1202_v28 = vadd.f32 %v3102_v5, %v3101_v34  ;;  %v3104_v53 = vld [vmem:[#allocation45_spill] sm:$0xff] }
 0x2f5   :  { %1690 = vst [vmem:[#allocation12 + $0x68] sm:$0xff] %v1642_v24  ;;  %v1644_v57 = vadd.f32 %v2882_v36, %v1579_v43  ;;  %v1580_v14 = vadd.f32 %v1356_v38, %v1003_v32  ;;  %v1535_v22 = vpop.f32.mrf.mxu1  ;;  %v1019_v1 = vadd.f32 %v3104_v53, %v3103_v58 }
 0x2f6   :  { %1703 = vst [vmem:[#allocation12 + $0xd0] sm:$0xff] %v1655_v41  ;;  %v1664_v16 = vadd.f32 %v2885_v0, %v1599_v47  ;;  %v1596_v49 = vadd.f32 %v1535_v22, %v1182_v50  ;;  %v1360_v10 = vpop.f32.mrf.mxu0  ;;  %v3105_v50 = vld [vmem:[#allocation26_spill] sm:$0xff] }
 0x2f7   :  { %1692 = vst [vmem:[#allocation12 + $0x78] sm:$0xff] %v1644_v57  ;;  %v1645_v25 = vadd.f32 %v2889_v19, %v1580_v14  ;;  %v1582_v40 = vadd.f32 %v1360_v10, %v1007_v42  ;;  %v2180_v2 = vpop.f32.mrf.mxu1  ;;  %v3106_v41 = vld [vmem:[#allocation46_spill] sm:$0xff]  ;;  %v3107_v57 = vld [vmem:[#allocation27_spill] sm:$0xff] }
 0x2f8   :  { %1712 = vst [vmem:[#allocation12 + $0x118] sm:$0xff] %v1664_v16  ;;  %v1661_v31 = vadd.f32 %v2885_v0, %v1596_v49  ;;  %v1605_v63 = vadd.f32 %v2180_v2, %v1197_v17  ;;  %v1362_v61 = vpop.f32.mrf.mxu0  ;;  %v1021_v47 = vadd.f32 %v3106_v41, %v3105_v50  ;;  %v3108_v14 = vld [vmem:[#allocation47_spill] sm:$0xff]  ;;  %v3109_v16 = vld [vmem:[#allocation28_spill] sm:$0xff] }
 0x2f9   :  { %1693 = vst [vmem:[#allocation12 + $0x80] sm:$0xff] %v1645_v25  ;;  %v1647_v7 = vadd.f32 %v2882_v36, %v1582_v40  ;;  %v1583_v54 = vadd.f32 %v1362_v61, %v1009_v45  ;;  %v1545_v12 = vpop.f32.mrf.mxu1  ;;  %v1025_v22 = vadd.f32 %v3108_v14, %v3107_v57  ;;  %v3110_v49 = vld [vmem:[#allocation48_spill] sm:$0xff]  ;;  %v3111_v25 = vld [vmem:[#allocation29_spill] sm:$0xff] }
 0x2fa   :  { %1709 = vst [vmem:[#allocation12 + $0x100] sm:$0xff] %v1661_v31  ;;  %v1670_v35 = vadd.f32 %v2885_v0, %v1605_v63  ;;  %v1602_v20 = vadd.f32 %v1545_v12, %v1192_v23  ;;  %v1366_v15 = vpop.f32.mrf.mxu0  ;;  %v1027_v10 = vadd.f32 %v3110_v49, %v3109_v16  ;;  %v3113_v23 = vld [vmem:[#allocation30_spill] sm:$0xff]  ;;  %v3126_v50 = vld [vmem:[#allocation56_spill] sm:$0xff] }
 0x2fb   :  { %1695 = vst [vmem:[#allocation12 + $0x90] sm:$0xff] %v1647_v7  ;;  %v1648_v8 = vadd.f32 %v2889_v19, %v1583_v54  ;;  %v1585_v52 = vadd.f32 %v1366_v15, %v1013_v18  ;;  %v2183_v13 = vpop.f32.mrf.mxu1  ;;  %v3114_v31 = vld [vmem:[#allocation50_spill] sm:$0xff]  ;;  %v3115_v18 = vld [vmem:[#allocation31_spill] sm:$0xff] }
 0x2fc   :  { %1718 = vst [vmem:[#allocation12 + $0x148] sm:$0xff] %v1670_v35  ;;  %v1667_v4 = vadd.f32 %v2885_v0, %v1602_v20  ;;  %v1611_v37 = vadd.f32 %v2183_v13, %v1207_v39  ;;  %v1368_v6 = vpop.f32.mrf.mxu0  ;;  %v1033_v63 = vadd.f32 %v3114_v31, %v3113_v23  ;;  %v3116_v7 = vld [vmem:[#allocation51_spill] sm:$0xff]  ;;  %v3117_v39 = vld [vmem:[#allocation32_spill] sm:$0xff] }
 0x2fd   :  { %1696 = vst [vmem:[#allocation12 + $0x98] sm:$0xff] %v1648_v8  ;;  %v1650_v3 = vadd.f32 %v2882_v36, %v1585_v52  ;;  %v1586_v44 = vadd.f32 %v1368_v6, %v1015_v51  ;;  %v1555_v32 = vpop.f32.mrf.mxu1  ;;  %v1037_v54 = vadd.f32 %v3116_v7, %v3115_v18  ;;  %v3118_v35 = vld [vmem:[#allocation52_spill] sm:$0xff]  ;;  %v3119_v51 = vld [vmem:[#allocation33_spill] sm:$0xff] }
 0x2fe   :  { %1715 = vst [vmem:[#allocation12 + $0x130] sm:$0xff] %v1667_v4  ;;  %v1676_v24 = vadd.f32 %v2885_v0, %v1611_v37  ;;  %v1608_v43 = vadd.f32 %v1555_v32, %v1202_v28  ;;  %v1372_v62 = vpop.f32.mrf.mxu0  ;;  %v1039_v20 = vadd.f32 %v3118_v35, %v3117_v39  ;;  %v3120_v8 = vld [vmem:[#allocation53_spill] sm:$0xff]  ;;  %v3121_v28 = vld [vmem:[#allocation34_spill] sm:$0xff] }
 0x2ff   :  { %1698 = vst [vmem:[#allocation12 + $0xa8] sm:$0xff] %v1650_v3  ;;  %v1651_v38 = vadd.f32 %v2889_v19, %v1586_v44  ;;  %v1588_v55 = vadd.f32 %v1372_v62, %v1019_v1  ;;  %v1043_v52 = vadd.f32 %v3120_v8, %v3119_v51  ;;  %v3122_v4 = vld [vmem:[#allocation54_spill] sm:$0xff]  ;;  %v3123_v1 = vld [vmem:[#allocation35_spill] sm:$0xff]  ;;  %v3125_v62 = vld [vmem:[#allocation36_spill] sm:$0xff] }
 0x300   :  { %1724 = vst [vmem:[#allocation12 + $0x178] sm:$0xff] %v1676_v24  ;;  %v1673_v30 = vadd.f32 %v2885_v0, %v1608_v43  ;;  %v1374_v42 = vpop.f32.mrf.mxu0  ;;  %v3112_v0 = vld [vmem:[#allocation49_spill] sm:$0xff]  ;;  %v1045_v37 = vadd.f32 %v3122_v4, %v3121_v28  ;;  %v3124_v3 = vld [vmem:[#allocation55_spill] sm:$0xff]  ;;  %v1051_v41 = vadd.f32 %v3126_v50, %v3125_v62 }
 0x301   :  { %1699 = vst [vmem:[#allocation12 + $0xb0] sm:$0xff] %v1651_v38  ;;  %v1653_v33 = vadd.f32 %v2882_v36, %v1588_v55  ;;  %v1589_v26 = vadd.f32 %v1374_v42, %v1021_v47  ;;  %v1031_v40 = vadd.f32 %v3112_v0, %v3111_v25  ;;  %v1049_v44 = vadd.f32 %v3124_v3, %v3123_v1  ;;  %v3128_v42 = vld [vmem:[#allocation58_spill] sm:$0xff] }
 0x302   :  { %1721 = vst [vmem:[#allocation12 + $0x160] sm:$0xff] %v1673_v30  ;;  %v1378_v17 = vpop.f32.mrf.mxu0  ;;  %v3127_v30 = vld [vmem:[#allocation38_spill] sm:$0xff] }
 0x303   :  { %1701 = vst [vmem:[#allocation12 + $0xc0] sm:$0xff] %v1653_v33  ;;  %v1654_v48 = vadd.f32 %v2889_v19, %v1589_v26  ;;  %v1591_v56 = vadd.f32 %v1378_v17, %v1025_v22  ;;  %v1055_v57 = vadd.f32 %v3128_v42, %v3127_v30  ;;  %v3129_v26 = vld [vmem:[#allocation40_spill] sm:$0xff] }
 0x304   :  { %v1380_v45 = vpop.f32.mrf.mxu0  ;;  %v3130_v17 = vld [vmem:[#allocation60_spill] sm:$0xff] }
 0x305   :  { %1702 = vst [vmem:[#allocation12 + $0xc8] sm:$0xff] %v1654_v48  ;;  %v1656_v2 = vadd.f32 %v2882_v36, %v1591_v56  ;;  %v1592_v21 = vadd.f32 %v1380_v45, %v1027_v10  ;;  %v1057_v16 = vadd.f32 %v3130_v17, %v3129_v26  ;;  %v3131_v56 = vld [vmem:[#allocation42_spill] sm:$0xff] }
 0x306   :  { %v1384_v9 = vpop.f32.mrf.mxu0  ;;  %v3132_v45 = vld [vmem:[#allocation62_spill] sm:$0xff] }
 0x307   :  { %1704 = vst [vmem:[#allocation12 + $0xd8] sm:$0xff] %v1656_v2  ;;  %v1657_v61 = vadd.f32 %v2889_v19, %v1592_v21  ;;  %v1594_v46 = vadd.f32 %v1384_v9, %v1031_v40  ;;  %v1061_v25 = vadd.f32 %v3132_v45, %v3131_v56  ;;  %v3133_v21 = vld [vmem:[#allocation44_spill] sm:$0xff] }
 0x308   :  { %v1386_v29 = vpop.f32.mrf.mxu0  ;;  %v3134_v9 = vld [vmem:[#allocation64_spill] sm:$0xff] }
 0x309   :  { %1705 = vst [vmem:[#allocation12 + $0xe0] sm:$0xff] %v1657_v61  ;;  %v1659_v12 = vadd.f32 %v2882_v36, %v1594_v46  ;;  %v1595_v59 = vadd.f32 %v1386_v29, %v1033_v63  ;;  %v1063_v23 = vadd.f32 %v3134_v9, %v3133_v21 }
 0x30a   :  { %v1390_v60 = vpop.f32.mrf.mxu0 }
 0x30b   :  { %1707 = vst [vmem:[#allocation12 + $0xf0] sm:$0xff] %v1659_v12  ;;  %v1660_v15 = vadd.f32 %v2889_v19, %v1595_v59  ;;  %v1597_v27 = vadd.f32 %v1390_v60, %v1037_v54 }
 0x30c   :  { %v1392_v11 = vpop.f32.mrf.mxu0 }
 0x30d   :  { %1708 = vst [vmem:[#allocation12 + $0xf8] sm:$0xff] %v1660_v15  ;;  %v1662_v13 = vadd.f32 %v2882_v36, %v1597_v27  ;;  %v1598_v34 = vadd.f32 %v1392_v11, %v1039_v20 }
 0x30e   :  { %v1396_v5 = vpop.f32.mrf.mxu0 }
 0x30f   :  { %1710 = vst [vmem:[#allocation12 + $0x108] sm:$0xff] %v1662_v13  ;;  %v1663_v6 = vadd.f32 %v2889_v19, %v1598_v34  ;;  %v1600_v58 = vadd.f32 %v1396_v5, %v1043_v52 }
 0x310   :  { %v1398_v53 = vpop.f32.mrf.mxu0 }
 0x311   :  { %1711 = vst [vmem:[#allocation12 + $0x110] sm:$0xff] %v1663_v6  ;;  %v1665_v32 = vadd.f32 %v2882_v36, %v1600_v58  ;;  %v1601_v24 = vadd.f32 %v1398_v53, %v1045_v37 }
 0x312   :  { %v1402_v43 = vpop.f32.mrf.mxu0 }
 0x313   :  { %1713 = vst [vmem:[#allocation12 + $0x120] sm:$0xff] %v1665_v32  ;;  %v1666_v47 = vadd.f32 %v2889_v19, %v1601_v24  ;;  %v1603_v38 = vadd.f32 %v1402_v43, %v1049_v44 }
 0x314   :  { %v1404_v55 = vpop.f32.mrf.mxu0 }
 0x315   :  { %1714 = vst [vmem:[#allocation12 + $0x128] sm:$0xff] %v1666_v47  ;;  %v1668_v14 = vadd.f32 %v2882_v36, %v1603_v38  ;;  %v1604_v22 = vadd.f32 %v1404_v55, %v1051_v41 }
 0x316   :  { %v1408_v33 = vpop.f32.mrf.mxu0 }
 0x317   :  { %1716 = vst [vmem:[#allocation12 + $0x138] sm:$0xff] %v1668_v14  ;;  %v1669_v49 = vadd.f32 %v2889_v19, %v1604_v22  ;;  %v1606_v10 = vadd.f32 %v1408_v33, %v1055_v57 }
 0x318   :  { %v1410_v48 = vpop.f32.mrf.mxu0 }
 0x319   :  { %1717 = vst [vmem:[#allocation12 + $0x140] sm:$0xff] %v1669_v49  ;;  %v1671_v0 = vadd.f32 %v2882_v36, %v1606_v10  ;;  %v1607_v40 = vadd.f32 %v1410_v48, %v1057_v16 }
 0x31a   :  { %v1414_v2 = vpop.f32.mrf.mxu0 }
 0x31b   :  { %1719 = vst [vmem:[#allocation12 + $0x150] sm:$0xff] %v1671_v0  ;;  %v1672_v31 = vadd.f32 %v2889_v19, %v1607_v40  ;;  %v1609_v63 = vadd.f32 %v1414_v2, %v1061_v25 }
 0x31c   :  { %v1416_v61 = vpop.f32.mrf.mxu0 }
 0x31d   :  { %1720 = vst [vmem:[#allocation12 + $0x158] sm:$0xff] %v1672_v31  ;;  %v1674_v46 = vadd.f32 %v2882_v36, %v1609_v63  ;;  %v1610_v29 = vadd.f32 %v1416_v61, %v1063_v23 }
 0x31f   :  { %1722 = vst [vmem:[#allocation12 + $0x168] sm:$0xff] %v1674_v46  ;;  %v1675_v18 = vadd.f32 %v2889_v19, %v1610_v29 }
 0x321   :  { %1723 = vst [vmem:[#allocation12 + $0x170] sm:$0xff] %v1675_v18 }
 0x322   :  { %2315 = shalt.err (!%p2312_p1)
}
 0x323   :  { %1736 = dma.vmem_to_hbm [thread:$0]  %s1731_s23, 6144, %s3038_s6, [#allocation5], %s2337_s9, %s2337_s9, %s2338_s10  }
 0x324   :  { %2330 = dma.done.wait [#allocation5], 6144  }
 0x325   :  { %2331 = vsyncadd [#allocation5], 4294961152 }
 0x326   :  { %1740 = vsyncpa [#allocation4], 1 }
 0x327   :  { %1741 = vsyncpa [#allocation7], 1 }
 0x328   :  { %1742 = vsyncpa [#allocation10], 1 }
 0x329   :  { %1743 = vsyncpa [#allocation5], 1 }

</bundles_post_ra>
